<compile_context>
chip_gen: v7x
topology: tpu7x:2x2x1
jax: 0.10.0
libtpu: 0.0.40
codegen_flags: <defaults>
</compile_context>

<pallas_src>
import functools
import math

import jax
import jax.numpy as jnp
from jax.experimental import pallas as pl
from jax.experimental.pallas import tpu as pltpu


def _round_up(x, m):
    return (x + m - 1) // m * m


def _label_smoothing_kernel(lp_ref, tgt_ref, out_ref, *, confidence, smooth_val,
                            conf_log_conf, smooth_log_smooth, ignore_indices,
                            tv, pad_cols, last_vtile):
    # lp_ref  : (tn, tv)  log-probabilities tile (native dtype, upcast here)
    # tgt_ref : (tn, 1)   int32 target indices (same block across the vocab axis)
    # out_ref : (tn, 1)   f32 per-row KL sums; resident accumulator across the vocab axis
    j = pl.program_id(1)

    @pl.when(j == 0)
    def _init():
        out_ref[...] = jnp.zeros_like(out_ref)

    lp = lp_ref[...].astype(jnp.float32)                       # (tn, tv)
    tgt = tgt_ref[...]                                          # (tn, 1) int32
    tgt_local = tgt - j * tv                                    # (tn, 1)

    # --- base: treat every column as a smoothed column (one reduce, no selects) ---
    #   sum_v (smooth_log_smooth - smooth_val * lp)  =  C - smooth_val * sum_v lp
    # Zero-padded vocab columns (last tile only) would each add smooth_log_smooth to the
    # base; fold the exact correction into the trace-time constant.
    row_sum_lp = jnp.sum(lp, axis=-1, keepdims=True)            # (tn, 1)
    c_full = smooth_log_smooth * float(tv)
    if pad_cols and smooth_log_smooth != 0.0:
        c_last = smooth_log_smooth * float(tv - pad_cols)
        base_c = jnp.where(j == last_vtile, c_last, c_full)
    else:
        base_c = c_full
    acc = base_c - smooth_val * row_sum_lp                      # (tn, 1)

    # --- ignore-index columns: remove their smoothed contribution (static column slices) ---
    for idx in ignore_indices:
        tile_of, col_in = idx // tv, idx % tv                   # trace-time constants
        lp_col = lp_ref[:, col_in:col_in + 1].astype(jnp.float32)   # (tn, 1)
        gate = jnp.where(j == tile_of, 1.0, 0.0)
        acc = acc - gate * (smooth_log_smooth - smooth_val * lp_col)

    # --- target column: masked extraction of lp[row, target] + per-row affine delta ---
    iota = jax.lax.broadcasted_iota(jnp.int32, lp.shape, 1)     # grid-invariant
    is_tgt = iota == tgt_local                                  # (tn, tv) bool
    tgt_lp = jnp.sum(jnp.where(is_tgt, lp, 0.0), axis=-1, keepdims=True)   # (tn, 1)
    in_tile = jnp.logical_and(tgt_local >= 0, tgt_local < tv)   # (tn, 1) bool

    conf_pw = conf_log_conf - confidence * tgt_lp               # (tn, 1)
    smooth_pw = smooth_log_smooth - smooth_val * tgt_lp         # (tn, 1)
    if ignore_indices:
        tgt_is_ign = tgt == ignore_indices[0]
        for idx in ignore_indices[1:]:
            tgt_is_ign = jnp.logical_or(tgt_is_ign, tgt == idx)
        # scatter_ overwrites ignore columns too: their smoothed term was already removed
        # above, so the delta must be the full confidence term for those rows.
        delta = conf_pw - jnp.where(tgt_is_ign, 0.0, smooth_pw)
    else:
        delta = conf_pw - smooth_pw

    acc = acc + jnp.where(in_tile, delta, 0.0)
    out_ref[...] += acc


def label_smoothing_loss(model_prob, target, *, smoothing, tgt_vocab_size,
                         ignore_indices=None, tn=512, tv=4096):
    """model_prob: (..., V) log-probs (any float dtype), target: (...) int. Returns (...,) f32."""
    if ignore_indices is None:
        ignore_indices = []
    ignore_indices = tuple(sorted(set(int(i) for i in ignore_indices)))

    V = model_prob.shape[-1]
    assert V == tgt_vocab_size
    lead_shape = model_prob.shape[:-1]

    lp2 = model_prob.reshape(-1, V)                 # keep native dtype (bf16 streams as bf16)
    tgt2 = target.reshape(-1, 1).astype(jnp.int32)
    N = lp2.shape[0]

    smooth_val = smoothing / float(tgt_vocab_size - 1 - len(ignore_indices))
    confidence = 1.0 - smoothing
    conf_log_conf = float(confidence * math.log(confidence)) if confidence > 0.0 else 0.0
    smooth_log_smooth = float(smooth_val * math.log(smooth_val)) if smooth_val > 0.0 else 0.0

    # --- tile sizing: lane-dense multiples of 128, shrunk to the (padded) problem ---
    itemsize = jnp.dtype(lp2.dtype).itemsize
    n128 = _round_up(max(N, 1), 128) // 128
    v128 = _round_up(V, 128) // 128
    tn = max(128, _round_up(min(tn, n128 * 128), 128))
    tv = max(128, _round_up(min(tv, v128 * 128), 128))

    # --- VMEM budget from the chip (v7x has only 64 MiB per TC); 2x = double buffer ---
    try:
        vmem_cap = int(pltpu.get_tpu_info().vmem_capacity_bytes)
    except Exception:
        vmem_cap = 64 * 1024 * 1024
    vmem_budget = vmem_cap * 3 // 4

    def _pipeline_bytes(tn_, tv_):
        return 2 * tn_ * tv_ * itemsize + (2 << 20)   # double-buffered lp tile + margin

    while _pipeline_bytes(tn, tv) > vmem_budget and tv > 128:
        tv = max(128, _round_up(tv // 2, 128))
    while _pipeline_bytes(tn, tv) > vmem_budget and tn > 128:
        tn = max(128, _round_up(tn // 2, 128))

    # --- megacore (v7x): give the row axis >= 2 tiles whenever possible ---
    if n128 >= 2:
        while _round_up(N, tn) // tn < 2 and tn > 128:
            tn -= 128

    N_pad = _round_up(max(N, 1), tn)
    V_pad = _round_up(V, tv)
    pad_cols = V_pad - V                      # zero-padded vocab columns (last tile only)
    n_vtiles = V_pad // tv

    if (N_pad, V_pad) != (N, V):
        lp2 = jnp.pad(lp2, ((0, N_pad - N), (0, V_pad - V)))
    if N_pad != N:
        tgt2 = jnp.pad(tgt2, ((0, N_pad - N), (0, 0)))

    kernel = functools.partial(
        _label_smoothing_kernel,
        confidence=float(confidence),
        smooth_val=float(smooth_val),
        conf_log_conf=conf_log_conf,
        smooth_log_smooth=smooth_log_smooth,
        ignore_indices=ignore_indices,
        tv=int(tv),
        pad_cols=int(pad_cols),
        last_vtile=int(n_vtiles - 1),
    )

    vmem_limit = int(max(8 << 20, min(vmem_budget, _pipeline_bytes(tn, tv))))

    out = pl.pallas_call(
        kernel,
        out_shape=jax.ShapeDtypeStruct((N_pad, 1), jnp.float32),
        grid_spec=pltpu.PrefetchScalarGridSpec(
            num_scalar_prefetch=0,
            grid=(N_pad // tn, n_vtiles),
            in_specs=[
                pl.BlockSpec((tn, tv), lambda i, j: (i, j)),   # log-prob tile (native dtype)
                pl.BlockSpec((tn, 1), lambda i, j: (i, 0)),    # targets (same block for all j)
            ],
            out_specs=pl.BlockSpec((tn, 1), lambda i, j: (i, 0)),  # resident accumulator
        ),
        compiler_params=pltpu.CompilerParams(
            dimension_semantics=("parallel", "arbitrary"),
            vmem_limit_bytes=vmem_limit,
        ),
    )(lp2, tgt2)

    return out.reshape(N_pad)[:N].reshape(lead_shape)


def _reference_loss(model_prob, target, smoothing, V, ignore_indices):
    """Pure-JAX mirror of the PyTorch module's forward()."""
    smooth_val = smoothing / float(V - 1 - len(ignore_indices))
    confidence = 1.0 - smoothing
    one_hot = jnp.full((V,), smooth_val, dtype=jnp.float32)
    for idx in ignore_indices:
        one_hot = one_hot.at[idx].set(0.0)
    lp = model_prob.astype(jnp.float32)
    true_dist = jnp.broadcast_to(one_hot, lp.shape)
    tgt_onehot = jax.nn.one_hot(target, V, dtype=jnp.bool_)
    true_dist = jnp.where(tgt_onehot, confidence, true_dist)
    pos = true_dist > 0
    pw = jnp.where(pos, true_dist * (jnp.log(jnp.where(pos, true_dist, 1.0)) - lp), 0.0)
    return pw.sum(-1)


if __name__ == "__main__":
    key = jax.random.PRNGKey(0)
    smoothing = 0.1
    ignore_indices = [0]

    # Case 1: default (large) tiles; odd N and non-multiple-of-128 V exercise the padded-column
    # constant correction and the ignore-index static-slice path.
    B1, S1, V1 = 2, 9, 1000
    k1, k2, k3, k4 = jax.random.split(key, 4)
    logits1 = jax.random.normal(k1, (B1, S1, V1), dtype=jnp.float32)
    logp1 = jax.nn.log_softmax(logits1, axis=-1)      # KLDivLoss input = log-probs
    tgt1 = jax.random.randint(k2, (B1, S1), minval=0, maxval=V1, dtype=jnp.int32)

    loss1 = label_smoothing_loss(logp1, tgt1, smoothing=smoothing,
                                 tgt_vocab_size=V1, ignore_indices=ignore_indices)
    loss1 = jax.block_until_ready(loss1)
    ref1 = _reference_loss(logp1, tgt1, smoothing, V1, ignore_indices)
    assert loss1.shape == (B1, S1)
    assert jnp.allclose(loss1, ref1, atol=1e-4, rtol=1e-4)

    # Case 2: explicit small tiles to exercise the 2-D grid (multiple row tiles sharded across
    # cores, multiple vocab tiles accumulating into the resident (tn,1) output block, and the
    # target/ignore deltas firing on interior vocab tiles).
    B2, S2, V2 = 4, 64, 512
    logits2 = jax.random.normal(k3, (B2, S2, V2), dtype=jnp.float32)
    logp2 = jax.nn.log_softmax(logits2, axis=-1)
    tgt2 = jax.random.randint(k4, (B2, S2), minval=0, maxval=V2, dtype=jnp.int32)

    loss2 = label_smoothing_loss(logp2, tgt2, smoothing=smoothing,
                                 tgt_vocab_size=V2, ignore_indices=ignore_indices,
                                 tn=128, tv=128)
    loss2 = jax.block_until_ready(loss2)
    ref2 = _reference_loss(logp2, tgt2, smoothing, V2, ignore_indices)
    assert loss2.shape == (B2, S2)
    assert jnp.allclose(loss2, ref2, atol=1e-4, rtol=1e-4)

    print("KERNEL_OK")
</pallas_src>

<mosaic_0001>
module attributes {stable_mosaic.version = 11 : i64} {
  func.func @_label_smoothing_kernel(%arg0: i32, %arg1: i32, %arg2: memref<128x1024xf32, #tpu.memory_space<vmem>>, %arg3: memref<128x1xi32, #tpu.memory_space<vmem>>, %arg4: memref<128x1xf32, #tpu.memory_space<vmem>>) attributes {dimension_semantics = [#tpu.dimension_semantics<parallel>, #tpu.dimension_semantics<arbitrary>], iteration_bounds = array<i64: 1, 1>, scalar_prefetch = 0 : i64, scratch_operands = 0 : i64, tpu.core_type = #tpu.core_type<tc>, window_params = [{transform_indices = @transform_0, window_bounds = array<i64: 128, 1024>}, {transform_indices = @transform_1, window_bounds = array<i64: 128, 1>}, {transform_indices = @transform_2, window_bounds = array<i64: 128, 1>}]} {
    %c0_i32 = arith.constant 0 : i32
    %0 = arith.cmpi eq, %arg1, %c0_i32 : i32
    %1 = arith.extui %0 : i1 to i32
    %c0_i32_0 = arith.constant 0 : i32
    %2 = arith.cmpi ne, %1, %c0_i32_0 : i32
    scf.if %2 {
      %cst_30 = arith.constant 0.000000e+00 : f32
      %57 = vector.broadcast %cst_30 : f32 to vector<128x1xf32>
      %c0_31 = arith.constant 0 : index
      %c0_32 = arith.constant 0 : index
      %58 = vector.load %arg4[%c0_31, %c0_32] : memref<128x1xf32, #tpu.memory_space<vmem>>, vector<128x1xf32>
      tpu.vector_store %arg4[%c0_31, %c0_32], %57 {strides = array<i32>} : memref<128x1xf32, #tpu.memory_space<vmem>>, vector<128x1xf32>,
    } else {
    }
    %c0 = arith.constant 0 : index
    %c0_1 = arith.constant 0 : index
    %3 = vector.load %arg2[%c0, %c0_1] : memref<128x1024xf32, #tpu.memory_space<vmem>>, vector<128x1024xf32>
    %c0_2 = arith.constant 0 : index
    %c0_3 = arith.constant 0 : index
    %4 = vector.load %arg3[%c0_2, %c0_3] : memref<128x1xi32, #tpu.memory_space<vmem>>, vector<128x1xi32>
    %c1024_i32 = arith.constant 1024 : i32
    %5 = arith.muli %arg1, %c1024_i32 : i32
    %6 = vector.broadcast %5 : i32 to vector<128x1xi32>
    %7 = arith.subi %4, %6 : vector<128x1xi32>
    %cst = arith.constant dense<0.000000e+00> : vector<128xf32>
    %8 = vector.multi_reduction <add>, %3, %cst [1] : vector<128x1024xf32> to vector<128xf32>
    %9 = vector.shape_cast %8 : vector<128xf32> to vector<128x1xf32>
    %c0_i32_4 = arith.constant 0 : i32
    %10 = arith.cmpi eq, %arg1, %c0_i32_4 : i32
    %cst_5 = arith.constant -0.922679186 : f32
    %cst_6 = arith.constant -0.944823503 : f32
    %11 = arith.select %10, %cst_5, %cst_6 : f32
    %cst_7 = arith.constant 1.00200399E-4 : f32
    %12 = vector.broadcast %cst_7 : f32 to vector<128x1xf32>
    %13 = arith.mulf %12, %9 : vector<128x1xf32>
    %14 = vector.broadcast %11 : f32 to vector<128x1xf32>
    %15 = arith.subf %14, %13 : vector<128x1xf32>
    %c0_8 = arith.constant 0 : index
    %c0_9 = arith.constant 0 : index
    %16 = vector.load %arg2[%c0_8, %c0_9] : memref<128x1024xf32, #tpu.memory_space<vmem>>, vector<128x1xf32>
    %c0_i32_10 = arith.constant 0 : i32
    %17 = arith.cmpi eq, %arg1, %c0_i32_10 : i32
    %cst_11 = arith.constant 1.000000e+00 : f32
    %cst_12 = arith.constant 0.000000e+00 : f32
    %18 = arith.select %17, %cst_11, %cst_12 : f32
    %cst_13 = arith.constant 1.00200399E-4 : f32
    %19 = vector.broadcast %cst_13 : f32 to vector<128x1xf32>
    %20 = arith.mulf %19, %16 : vector<128x1xf32>
    %cst_14 = arith.constant -9.22679202E-4 : f32
    %21 = vector.broadcast %cst_14 : f32 to vector<128x1xf32>
    %22 = arith.subf %21, %20 : vector<128x1xf32>
    %23 = vector.broadcast %18 : f32 to vector<128x1xf32>
    %24 = arith.mulf %23, %22 : vector<128x1xf32>
    %25 = arith.subf %15, %24 : vector<128x1xf32>
    %26 = tpu.iota {dimensions = array<i32: 1>} : vector<128x1024xi32>
    %27 = vector.broadcast %7 : vector<128x1xi32> to vector<128x1024xi32>
    %28 = arith.cmpi eq, %26, %27 : vector<128x1024xi32>
    %cst_15 = arith.constant 0.000000e+00 : f32
    %29 = vector.broadcast %cst_15 : f32 to vector<128x1024xf32>
    %30 = arith.select %28, %3, %29 : vector<128x1024xi1>, vector<128x1024xf32>
    %cst_16 = arith.constant dense<0.000000e+00> : vector<128xf32>
    %31 = vector.multi_reduction <add>, %30, %cst_16 [1] : vector<128x1024xf32> to vector<128xf32>
    %32 = vector.shape_cast %31 : vector<128xf32> to vector<128x1xf32>
    %c0_i32_17 = arith.constant 0 : i32
    %33 = vector.broadcast %c0_i32_17 : i32 to vector<128x1xi32>
    %34 = arith.cmpi sge, %7, %33 : vector<128x1xi32>
    %c1024_i32_18 = arith.constant 1024 : i32
    %35 = vector.broadcast %c1024_i32_18 : i32 to vector<128x1xi32>
    %36 = arith.cmpi slt, %7, %35 : vector<128x1xi32>
    %37 = arith.andi %34, %36 : vector<128x1xi1>
    %cst_19 = arith.constant 0.899999976 : f32
    %38 = vector.broadcast %cst_19 : f32 to vector<128x1xf32>
    %39 = arith.mulf %38, %32 : vector<128x1xf32>
    %cst_20 = arith.constant -0.0948244631 : f32
    %40 = vector.broadcast %cst_20 : f32 to vector<128x1xf32>
    %41 = arith.subf %40, %39 : vector<128x1xf32>
    %cst_21 = arith.constant 1.00200399E-4 : f32
    %42 = vector.broadcast %cst_21 : f32 to vector<128x1xf32>
    %43 = arith.mulf %42, %32 : vector<128x1xf32>
    %cst_22 = arith.constant -9.22679202E-4 : f32
    %44 = vector.broadcast %cst_22 : f32 to vector<128x1xf32>
    %45 = arith.subf %44, %43 : vector<128x1xf32>
    %c0_i32_23 = arith.constant 0 : i32
    %46 = vector.broadcast %c0_i32_23 : i32 to vector<128x1xi32>
    %47 = arith.cmpi eq, %4, %46 : vector<128x1xi32>
    %cst_24 = arith.constant 0.000000e+00 : f32
    %48 = vector.broadcast %cst_24 : f32 to vector<128x1xf32>
    %49 = arith.select %47, %48, %45 : vector<128x1xi1>, vector<128x1xf32>
    %50 = arith.subf %41, %49 : vector<128x1xf32>
    %cst_25 = arith.constant 0.000000e+00 : f32
    %51 = vector.broadcast %cst_25 : f32 to vector<128x1xf32>
    %52 = arith.select %37, %50, %51 : vector<128x1xi1>, vector<128x1xf32>
    %53 = arith.addf %25, %52 : vector<128x1xf32>
    %c0_26 = arith.constant 0 : index
    %c0_27 = arith.constant 0 : index
    %54 = vector.load %arg4[%c0_26, %c0_27] : memref<128x1xf32, #tpu.memory_space<vmem>>, vector<128x1xf32>
    %55 = arith.addf %54, %53 : vector<128x1xf32>
    %c0_28 = arith.constant 0 : index
    %c0_29 = arith.constant 0 : index
    %56 = vector.load %arg4[%c0_28, %c0_29] : memref<128x1xf32, #tpu.memory_space<vmem>>, vector<128x1xf32>
    tpu.vector_store %arg4[%c0_28, %c0_29], %55 {strides = array<i32>} : memref<128x1xf32, #tpu.memory_space<vmem>>, vector<128x1xf32>,
    return
  }
  func.func @transform_0(%arg0: i32, %arg1: i32) -> (i32, i32) {
    %c0_i32 = arith.constant 0 : i32
    return %arg0, %arg1 : i32, i32
  }
  func.func @transform_1(%arg0: i32, %arg1: i32) -> (i32, i32) {
    %c0_i32 = arith.constant 0 : i32
    %c0_i32_0 = arith.constant 0 : i32
    return %arg0, %c0_i32 : i32, i32
  }
  func.func @transform_2(%arg0: i32, %arg1: i32) -> (i32, i32) {
    %c0_i32 = arith.constant 0 : i32
    %c0_i32_0 = arith.constant 0 : i32
    return %arg0, %c0_i32 : i32, i32
  }
}

</mosaic_0001>

<bundles_post_ra>
// kernel: tpu_custom_call.1
= control target key start
LH: loop header
LB: loop body
LE: loop exit
PB: predicated region body
PF: predicated region fallthrough
CT: control target
= control target key end

     0   :  { %7 = vsyncpa [#allocation3], 0  ;;  %s1221_s9 = smov [#allocation2]   ;;  %s2518_s0 = inlined_call_operand.hbm [shape: f32[128,1024], index: 0, kind: input, shape index: {}]   ;;  %s2519_s1 = inlined_call_operand.vmem [shape: s32[128,1], index: 1, kind: input, shape index: {}]   ;;  %s2520_s2 = inlined_call_operand.vmem [shape: f32[128,1], index: 2, kind: output, shape index: {}]  }
   0x1   :  { %s13_s10 = sshll.u32 %s1221_s9, 4  ;;  %s1197_s13 = scalar_lea.hbm %s2518_s0, 16384  ;;  %s14_s10 = int_to_ptr.vmem [resolvable:$true] %s13_s10 }
   0x2   :  { %p1198_p0 = scmp.ne.s32.totalorder %s2518_s0, %s1197_s13  ;;  %p1201_p1 = scmp.lt.u32.totalorder %s1197_s13, %s2518_s0 }
   0x4   :  { %p1203_p2 = pnand %p1201_p1, %p1198_p0 }
   0x6   :  { %1206 = shalt.err (!%p1203_p2)
}
   0x7   :  { %s1207_s18 = scalar_lea.vmem %s14_s10, 16384  ;;  %p1212_p4 = scmp.lt.s32.totalorder %s14_s10, %s14_s10 }
   0x8   :  { %p1208_p3 = scmp.ne.s32.totalorder %s14_s10, %s1207_s18  ;;  %p1213_p5 = scmp.lt.s32.totalorder %s1207_s18, %s1207_s18 }
   0xa   :  { %p1214_p6 = por %p1213_p5, %p1212_p4 }
   0xc   :  { %p1215_p7 = pnand %p1214_p6, %p1208_p3 }
   0xe   :  { %1218 = shalt.err (!%p1215_p7)
}
   0xf   :  { %s1222_s19 = smov 1024   ;;  %s1223_s20 = smov 64  }
  0x10   :  { %19 = dma.hbm_to_vmem [thread:$0]  %s2518_s0, 16384, %s14_s10, [#allocation3], %s1222_s19, %s1222_s19, %s1223_s20  }
  0x11   :  { %1219 = dma.done.wait [#allocation3], 16384  }
  0x12   :  { %1220 = vsyncadd [#allocation3], 4294950912  ;;  %v1224_v0 = vmov 0   ;;  %v176_v1 = vld [vmem:[%s2519_s1 + $0x10] sm:$0xff]  ;;  %v174_v2 = vld [vmem:[%s2519_s1] sm:$0xff]  ;;  %vm29_vm0 = vcmask 7168  }
  0x13   :  { %1177 = vset.pattern.permute.xlu1 %v1224_v0  ;;  %1176 = vset.pattern.permute.xlu0 %v1224_v0  ;;  %v177_v3 = vld [vmem:[%s2519_s1 + $0x18] sm:$0xff]  ;;  %v175_v4 = vld [vmem:[%s2519_s1 + $0x8] sm:$0xff]  ;;  %v178_v6 = vld [vmem:[%s2519_s1 + $0x20] sm:$0xff] }
  0x14   :  { %484 = vperm.xlu1 %1177, %v176_v1   ;;  %478 = vperm.xlu0 %1176, %v174_v2   ;;  %v179_v5 = vld [vmem:[%s2519_s1 + $0x28] sm:$0xff]  ;;  %v181_v7 = vld [vmem:[%s2519_s1 + $0x38] sm:$0xff]  ;;  %v180_v8 = vld [vmem:[%s2519_s1 + $0x30] sm:$0xff] }
  0x15   :  { %v183_v9 = vld [vmem:[%s2519_s1 + $0x48] sm:$0xff]  ;;  %v182_v10 = vld [vmem:[%s2519_s1 + $0x40] sm:$0xff]  ;;  %v185_v11 = vld [vmem:[%s2519_s1 + $0x58] sm:$0xff] }
  0x16   :  { %v184_v12 = vld [vmem:[%s2519_s1 + $0x50] sm:$0xff]  ;;  %v187_v13 = vld [vmem:[%s2519_s1 + $0x68] sm:$0xff]  ;;  %v186_v14 = vld [vmem:[%s2519_s1 + $0x60] sm:$0xff] }
  0x17   :  { %v189_v15 = vld [vmem:[%s2519_s1 + $0x78] sm:$0xff]  ;;  %v188_v16 = vld [vmem:[%s2519_s1 + $0x70] sm:$0xff]  ;;  %v1301_v17 = vld [vmem:[#allocation2] sm:$0xff] }
  0x18   :  { %487 = vperm.xlu1 %1177, %v177_v3   ;;  %481 = vperm.xlu0 %1176, %v175_v4   ;;  %v1303_v18 = vld [vmem:[#allocation2 + $0x8] sm:$0xff]  ;;  %v1305_v19 = vld [vmem:[#allocation2 + $0x80] sm:$0xff]  ;;  %v1315_v24 = vld [vmem:[#allocation2 + $0x10] sm:$0xff] }
  0x19   :  { %v1307_v20 = vld [vmem:[#allocation2 + $0x88] sm:$0xff]  ;;  %v208_v21 = vadd.f32 %v1303_v18, %v1301_v17  ;;  %v1311_v22 = vld [vmem:[#allocation2 + $0x40] sm:$0xff]  ;;  %v1319_v26 = vld [vmem:[#allocation2 + $0x90] sm:$0xff] }
  0x1a   :  { %2597 = vst [vmem:[#allocation5_spill] sm:$0xff] %v1307_v20  ;;  %v1313_v23 = vld [vmem:[#allocation2 + $0x48] sm:$0xff]  ;;  %v226_v25 = vadd.f32 %v1307_v20, %v1305_v19  ;;  %2598 = vst [vmem:[#allocation6_spill] sm:$0xff] %v1319_v26  ;;  %v1321_v27 = vld [vmem:[#allocation2 + $0x50] sm:$0xff] }
  0x1b   :  { %v217_v28 = vadd.f32 %v1313_v23, %v1311_v22  ;;  %v1325_v29 = vld [vmem:[#allocation2 + $0x100] sm:$0xff]  ;;  %v209_v30 = vadd.f32 %v208_v21, %v1315_v24  ;;  %v1328_v31 = vld [vmem:[#allocation2 + $0x108] sm:$0xff]  ;;  %v1334_v34 = vld [vmem:[#allocation2 + $0x18] sm:$0xff] }
  0x1c   :  { %493 = vperm.xlu1 %1177, %v179_v5   ;;  %490 = vperm.xlu0 %1176, %v178_v6   ;;  %2599 = vst [vmem:[#allocation7_spill] sm:$0xff] %v1325_v29  ;;  %2600 = vst [vmem:[#allocation8_spill] sm:$0xff] %v1328_v31  ;;  %v1330_v32 = vld [vmem:[#allocation2 + $0xc0] sm:$0xff]  ;;  %v1332_v33 = vld [vmem:[#allocation2 + $0xc8] sm:$0xff]  ;;  %v227_v35 = vadd.f32 %v226_v25, %v1319_v26  ;;  %v244_v40 = vadd.f32 %v1328_v31, %v1325_v29 }
  0x1d   :  { %v1337_v36 = vld [vmem:[#allocation2 + $0x98] sm:$0xff]  ;;  %v218_v38 = vadd.f32 %v217_v28, %v1321_v27  ;;  %v1342_v39 = vld [vmem:[#allocation2 + $0x110] sm:$0xff]  ;;  %v235_v41 = vadd.f32 %v1332_v33, %v1330_v32  ;;  %v210_v42 = vadd.f32 %v209_v30, %v1334_v34  ;;  %v1351_v44 = vld [vmem:[#allocation2 + $0x140] sm:$0xff] }
  0x1e   :  { %2601 = vst [vmem:[#allocation9_spill] sm:$0xff] %v1337_v36  ;;  %v1339_v37 = vld [vmem:[#allocation2 + $0x58] sm:$0xff]  ;;  %2602 = vst [vmem:[#allocation10_spill] sm:$0xff] %v1342_v39  ;;  %v1349_v43 = vld [vmem:[#allocation2 + $0xd0] sm:$0xff]  ;;  %v228_v47 = vadd.f32 %v227_v35, %v1337_v36  ;;  %v245_v53 = vadd.f32 %v244_v40, %v1342_v39 }
  0x1f   :  { %v1353_v45 = vld [vmem:[#allocation2 + $0x148] sm:$0xff]  ;;  %v1355_v46 = vld [vmem:[#allocation2 + $0x20] sm:$0xff]  ;;  %v219_v52 = vadd.f32 %v218_v38, %v1339_v37  ;;  %v236_v54 = vadd.f32 %v235_v41, %v1349_v43  ;;  %v1372_v57 = vld [vmem:[#allocation2 + $0x118] sm:$0xff] }
  0x20   :  { %499 = vperm.xlu1 %1177, %v181_v7   ;;  %496 = vperm.xlu0 %1176, %v180_v8   ;;  %v1358_v48 = vld [vmem:[#allocation2 + $0x180] sm:$0xff]  ;;  %v1360_v49 = vld [vmem:[#allocation2 + $0x188] sm:$0xff]  ;;  %v253_v55 = vadd.f32 %v1353_v45, %v1351_v44  ;;  %v211_v56 = vadd.f32 %v210_v42, %v1355_v46  ;;  %2606 = vst [vmem:[#allocation14_spill] sm:$0xff] %v1372_v57  ;;  %v1374_v58 = vld [vmem:[#allocation2 + $0xd8] sm:$0xff] }
  0x21   :  { %2603 = vst [vmem:[#allocation11_spill] sm:$0xff] %v1358_v48  ;;  %2604 = vst [vmem:[#allocation12_spill] sm:$0xff] %v1360_v49  ;;  %v1362_v50 = vld [vmem:[#allocation2 + $0xa0] sm:$0xff]  ;;  %v1376_v59 = vld [vmem:[#allocation2 + $0x150] sm:$0xff]  ;;  %v262_v61 = vadd.f32 %v1360_v49, %v1358_v48 }
  0x22   :  { %2605 = vst [vmem:[#allocation13_spill] sm:$0xff] %v1362_v50  ;;  %v1364_v51 = vld [vmem:[#allocation2 + $0x60] sm:$0xff]  ;;  %v1378_v60 = vld [vmem:[#allocation2 + $0x28] sm:$0xff]  ;;  %v229_v0 = vadd.f32 %v228_v47, %v1362_v50  ;;  %v1387_v1 = vld [vmem:[#allocation2 + $0x190] sm:$0xff] }
  0x23   :  { %v1382_v62 = vld [vmem:[#allocation2 + $0x1c0] sm:$0xff]  ;;  %v1384_v63 = vld [vmem:[#allocation2 + $0x1c8] sm:$0xff]  ;;  %2609 = vst [vmem:[#allocation17_spill] sm:$0xff] %v1387_v1  ;;  %v1393_v4 = vld [vmem:[#allocation2 + $0x30] sm:$0xff]  ;;  %v220_v7 = vadd.f32 %v219_v52, %v1364_v51  ;;  %v263_v25 = vadd.f32 %v262_v61, %v1387_v1 }
  0x24   :  { %505 = vperm.xlu1 %1177, %v183_v9   ;;  %502 = vperm.xlu0 %1176, %v182_v10   ;;  %2607 = vst [vmem:[#allocation15_spill] sm:$0xff] %v1382_v62  ;;  %2608 = vst [vmem:[#allocation16_spill] sm:$0xff] %v1384_v63  ;;  %v1389_v2 = vld [vmem:[#allocation2 + $0x200] sm:$0xff]  ;;  %v1391_v3 = vld [vmem:[#allocation2 + $0x208] sm:$0xff]  ;;  %v246_v9 = vadd.f32 %v245_v53, %v1372_v57  ;;  %v237_v10 = vadd.f32 %v236_v54, %v1374_v58 }
  0x25   :  { %2610 = vst [vmem:[#allocation18_spill] sm:$0xff] %v1389_v2  ;;  %2611 = vst [vmem:[#allocation19_spill] sm:$0xff] %v1391_v3  ;;  %v1395_v5 = vld [vmem:[#allocation2 + $0xa8] sm:$0xff]  ;;  %v1400_v8 = vld [vmem:[#allocation2 + $0x120] sm:$0xff]  ;;  %v280_v28 = vadd.f32 %v1391_v3, %v1389_v2 }
  0x26   :  { %2612 = vst [vmem:[#allocation20_spill] sm:$0xff] %v1395_v5  ;;  %v1397_v6 = vld [vmem:[#allocation2 + $0x68] sm:$0xff]  ;;  %2613 = vst [vmem:[#allocation21_spill] sm:$0xff] %v1400_v8  ;;  %v1414_v21 = vld [vmem:[#allocation2 + $0xb0] sm:$0xff]  ;;  %v230_v40 = vadd.f32 %v229_v0, %v1395_v5 }
  0x27   :  { %2615 = vst [vmem:[#allocation23_spill] sm:$0xff] %v1414_v21  ;;  %v1419_v30 = vld [vmem:[#allocation2 + $0x1d0] sm:$0xff]  ;;  %v1421_v35 = vld [vmem:[#allocation2 + $0x240] sm:$0xff]  ;;  %v1423_v38 = vld [vmem:[#allocation2 + $0x248] sm:$0xff]  ;;  %v221_v54 = vadd.f32 %v220_v7, %v1397_v6 }
  0x28   :  { %511 = vperm.xlu1 %1177, %v185_v11   ;;  %508 = vperm.xlu0 %1176, %v184_v12   ;;  %v254_v11 = vadd.f32 %v253_v55, %v1376_v59  ;;  %v212_v12 = vadd.f32 %v211_v56, %v1378_v60  ;;  %2616 = vst [vmem:[#allocation24_spill] sm:$0xff] %v1419_v30  ;;  %2617 = vst [vmem:[#allocation25_spill] sm:$0xff] %v1421_v35  ;;  %v1426_v41 = vld [vmem:[#allocation2 + $0x210] sm:$0xff]  ;;  %v1428_v42 = vld [vmem:[#allocation2 + $0x280] sm:$0xff] }
  0x29   :  { %2618 = vst [vmem:[#allocation26_spill] sm:$0xff] %v1423_v38  ;;  %2619 = vst [vmem:[#allocation27_spill] sm:$0xff] %v1426_v41  ;;  %v1430_v47 = vld [vmem:[#allocation2 + $0x288] sm:$0xff]  ;;  %v1432_v52 = vld [vmem:[#allocation2 + $0x38] sm:$0xff]  ;;  %v247_v56 = vadd.f32 %v246_v9, %v1400_v8  ;;  %v289_v9 = vadd.f32 %v1423_v38, %v1421_v35 }
  0x2a   :  { %2620 = vst [vmem:[#allocation28_spill] sm:$0xff] %v1428_v42  ;;  %2621 = vst [vmem:[#allocation29_spill] sm:$0xff] %v1430_v47  ;;  %v1434_v53 = vld [vmem:[#allocation2 + $0x70] sm:$0xff]  ;;  %v1437_v55 = vld [vmem:[#allocation2 + $0x128] sm:$0xff]  ;;  %v213_v2 = vadd.f32 %v212_v12, %v1393_v4  ;;  %v298_v12 = vadd.f32 %v1430_v47, %v1428_v42 }
  0x2b   :  { %2622 = vst [vmem:[#allocation30_spill] sm:$0xff] %v1437_v55  ;;  %v1440_v61 = vld [vmem:[#allocation2 + $0xe8] sm:$0xff]  ;;  %v1445_v1 = vld [vmem:[#allocation2 + $0x1a0] sm:$0xff]  ;;  %v1449_v48 = vld [vmem:[#allocation2 + $0x218] sm:$0xff]  ;;  %v248_v47 = vadd.f32 %v247_v56, %v1437_v55 }
  0x2c   :  { %517 = vperm.xlu1 %1177, %v187_v13   ;;  %514 = vperm.xlu0 %1176, %v186_v14   ;;  %v1406_v13 = vld [vmem:[#allocation2 + $0xe0] sm:$0xff]  ;;  %v1408_v14 = vld [vmem:[#allocation2 + $0x198] sm:$0xff]  ;;  %2623 = vst [vmem:[#allocation31_spill] sm:$0xff] %v1445_v1  ;;  %2625 = vst [vmem:[#allocation33_spill] sm:$0xff] %v1449_v48 }
  0x2d   :  { %2614 = vst [vmem:[#allocation22_spill] sm:$0xff] %v1408_v14  ;;  %v238_v0 = vadd.f32 %v237_v10, %v1406_v13  ;;  %v1447_v49 = vld [vmem:[#allocation2 + $0x160] sm:$0xff]  ;;  %v1451_v57 = vld [vmem:[#allocation2 + $0x1d8] sm:$0xff]  ;;  %v264_v10 = vadd.f32 %v263_v25, %v1408_v14  ;;  %v1462_v39 = vld [vmem:[#allocation2 + $0x250] sm:$0xff]  ;;  %v222_v25 = vadd.f32 %v221_v54, %v1434_v53 }
  0x2e   :  { %2624 = vst [vmem:[#allocation32_spill] sm:$0xff] %v1447_v49  ;;  %2626 = vst [vmem:[#allocation34_spill] sm:$0xff] %v1451_v57  ;;  %v1456_v8 = vld [vmem:[#allocation2 + $0xb8] sm:$0xff]  ;;  %v1464_v31 = vld [vmem:[#allocation2 + $0x2c0] sm:$0xff]  ;;  %v290_v56 = vadd.f32 %v289_v9, %v1462_v39 }
  0x2f   :  { %2627 = vst [vmem:[#allocation35_spill] sm:$0xff] %v1456_v8  ;;  %2628 = vst [vmem:[#allocation36_spill] sm:$0xff] %v1462_v39  ;;  %v1466_v29 = vld [vmem:[#allocation2 + $0x2c8] sm:$0xff]  ;;  %v1471_v38 = vld [vmem:[#allocation2 + $0x300] sm:$0xff] }
  0x30   :  { %523 = vperm.xlu1 %1177, %v189_v15   ;;  %520 = vperm.xlu0 %1176, %v188_v16   ;;  %v1410_v15 = vld [vmem:[#allocation2 + $0x158] sm:$0xff]  ;;  %v271_v16 = vadd.f32 %v1384_v63, %v1382_v62  ;;  %2629 = vst [vmem:[#allocation37_spill] sm:$0xff] %v1464_v31  ;;  %2630 = vst [vmem:[#allocation38_spill] sm:$0xff] %v1466_v29  ;;  %v143_v35 = vld [vmem:[#allocation2 + $0x308] sm:$0xff]  ;;  %v307_v55 = vadd.f32 %v1466_v29, %v1464_v31 }
  0x31   :  { %v255_v3 = vadd.f32 %v254_v11, %v1410_v15  ;;  %v281_v11 = vadd.f32 %v280_v28, %v1426_v41  ;;  %2632 = vst [vmem:[#allocation40_spill] sm:$0xff] %v1471_v38  ;;  %v1473_v5 = vld [vmem:[#allocation2 + $0x78] sm:$0xff]  ;;  %v1476_v28 = vld [vmem:[#allocation2 + $0x130] sm:$0xff]  ;;  %v239_v41 = vadd.f32 %v238_v0, %v1440_v61  ;;  %v1486_v50 = vld [vmem:[#allocation2 + $0x168] sm:$0xff]  ;;  %v265_v0 = vadd.f32 %v264_v10, %v1445_v1 }
  0x32   :  { %v272_v7 = vadd.f32 %v271_v16, %v1419_v30  ;;  %v231_v16 = vadd.f32 %v230_v40, %v1414_v21  ;;  %v1469_v30 = vld [vmem:[#allocation2 + $0x290] sm:$0xff]  ;;  %2633 = vst [vmem:[#allocation41_spill] sm:$0xff] %v1476_v28  ;;  %v214_v40 = vadd.f32 %v213_v2, %v1432_v52  ;;  %v1484_v21 = vld [vmem:[#allocation2 + $0x1a8] sm:$0xff]  ;;  %2635 = vst [vmem:[#allocation43_spill] sm:$0xff] %v1486_v50 }
  0x33   :  { %2631 = vst [vmem:[#allocation39_spill] sm:$0xff] %v1469_v30  ;;  %v1479_v42 = vld [vmem:[#allocation2 + $0xf0] sm:$0xff]  ;;  %v256_v14 = vadd.f32 %v255_v3, %v1447_v49  ;;  %2634 = vst [vmem:[#allocation42_spill] sm:$0xff] %v1484_v21  ;;  %v1488_v63 = vld [vmem:[#allocation2 + $0x1e0] sm:$0xff]  ;;  %v282_v3 = vadd.f32 %v281_v11, %v1449_v48  ;;  %v299_v2 = vadd.f32 %v298_v12, %v1469_v30 }
  0x34   :  { %v273_v54 = vadd.f32 %v272_v7, %v1451_v57  ;;  %v1491_v62 = vld [vmem:[#allocation2 + $0x258] sm:$0xff]  ;;  %v316_v36 = vadd.f32 %v143_v35, %v1471_v38  ;;  %v1500_v49 = vld [vmem:[#allocation2 + $0x2d0] sm:$0xff]  ;;  %v1502_v26 = vld [vmem:[#allocation2 + $0x340] sm:$0xff]  ;;  %v232_v57 = vadd.f32 %v231_v16, %v1456_v8  ;;  %v223_v10 = vadd.f32 %v222_v25, %v1473_v5 }
  0x35   :  { %2636 = vst [vmem:[#allocation44_spill] sm:$0xff] %v1491_v62  ;;  %2637 = vst [vmem:[#allocation45_spill] sm:$0xff] %v1500_v49  ;;  %v1504_v7 = vld [vmem:[#allocation2 + $0x348] sm:$0xff]  ;;  %v1507_v9 = vld [vmem:[#allocation2 + $0x220] sm:$0xff]  ;;  %v249_v35 = vadd.f32 %v248_v47, %v1476_v28  ;;  %v240_v38 = vadd.f32 %v239_v41, %v1479_v42  ;;  %v257_v30 = vadd.f32 %v256_v14, %v1486_v50 }
  0x36   :  { %2638 = vst [vmem:[#allocation46_spill] sm:$0xff] %v1502_v26  ;;  %2639 = vst [vmem:[#allocation47_spill] sm:$0xff] %v1504_v7  ;;  %v1509_v39 = vld [vmem:[#allocation2 + $0x298] sm:$0xff]  ;;  %v1511_v29 = vld [vmem:[#allocation2 + $0x310] sm:$0xff]  ;;  %v274_v31 = vadd.f32 %v273_v54, %v1488_v63  ;;  %v291_v25 = vadd.f32 %v290_v56, %v1491_v62  ;;  %v308_v8 = vadd.f32 %v307_v55, %v1500_v49 }
  0x37   :  { %2640 = vst [vmem:[#allocation48_spill] sm:$0xff] %v1507_v9  ;;  %2641 = vst [vmem:[#allocation49_spill] sm:$0xff] %v1509_v39  ;;  %v1514_v11 = vld [vmem:[#allocation2 + $0x138] sm:$0xff]  ;;  %v1521_v16 = vld [vmem:[#allocation2 + $0x1b0] sm:$0xff]  ;;  %v325_v47 = vadd.f32 %v1504_v7, %v1502_v26  ;;  %v266_v41 = vadd.f32 %v265_v0, %v1484_v21  ;;  %v283_v14 = vadd.f32 %v282_v3, %v1507_v9 }
  0x38   :  { %2642 = vst [vmem:[#allocation50_spill] sm:$0xff] %v1511_v29  ;;  %2643 = vst [vmem:[#allocation51_spill] sm:$0xff] %v1514_v11  ;;  %v1517_v12 = vld [vmem:[#allocation2 + $0xf8] sm:$0xff]  ;;  %v1523_v48 = vld [vmem:[#allocation2 + $0x170] sm:$0xff]  ;;  %v317_v50 = vadd.f32 %v316_v36, %v1511_v29  ;;  %v250_v0 = vadd.f32 %v249_v35, %v1514_v11 }
  0x39   :  { %v1525_v1 = vld [vmem:[#allocation2 + $0x1e8] sm:$0xff]  ;;  %v1535_v28 = vld [vmem:[#allocation2 + $0x260] sm:$0xff]  ;;  %v1538_v20 = vld [vmem:[#allocation2 + $0x2d8] sm:$0xff]  ;;  %v241_v3 = vadd.f32 %v240_v38, %v1517_v12  ;;  %v267_v38 = vadd.f32 %v266_v41, %v1521_v16 }
  0x3a   :  { %2644 = vst [vmem:[#allocation52_spill] sm:$0xff] %v1538_v20  ;;  %v1540_v54 = vld [vmem:[#allocation2 + $0x350] sm:$0xff]  ;;  %v1542_v56 = vld [vmem:[#allocation2 + $0x228] sm:$0xff]  ;;  %v1544_v55 = vld [vmem:[#allocation2 + $0x2a0] sm:$0xff]  ;;  %v275_v9 = vadd.f32 %v274_v31, %v1525_v1  ;;  %v292_v7 = vadd.f32 %v291_v25, %v1535_v28  ;;  %v309_v26 = vadd.f32 %v308_v8, %v1538_v20 }
  0x3b   :  { %2645 = vst [vmem:[#allocation53_spill] sm:$0xff] %v1540_v54  ;;  %2646 = vst [vmem:[#allocation54_spill] sm:$0xff] %v1542_v56  ;;  %v1546_v49 = vld [vmem:[#allocation2 + $0x318] sm:$0xff]  ;;  %v1555_v29 = vld [vmem:[#allocation2 + $0x1f0] sm:$0xff]  ;;  %v326_v21 = vadd.f32 %v325_v47, %v1540_v54 }
  0x3c   :  { %2647 = vst [vmem:[#allocation55_spill] sm:$0xff] %v1544_v55  ;;  %2648 = vst [vmem:[#allocation56_spill] sm:$0xff] %v1546_v49  ;;  %v1553_v36 = vld [vmem:[#allocation2 + $0x178] sm:$0xff]  ;;  %v1564_v35 = vld [vmem:[#allocation2 + $0x268] sm:$0xff]  ;;  %v318_v62 = vadd.f32 %v317_v50, %v1546_v49 }
  0x3d   :  { %v1567_v11 = vld [vmem:[#allocation2 + $0x2e0] sm:$0xff]  ;;  %v1569_v31 = vld [vmem:[#allocation2 + $0x358] sm:$0xff]  ;;  %v1571_v25 = vld [vmem:[#allocation2 + $0x230] sm:$0xff] }
  0x3e   :  { %2649 = vst [vmem:[#allocation57_spill] sm:$0xff] %v1569_v31  ;;  %2650 = vst [vmem:[#allocation58_spill] sm:$0xff] %v1571_v25  ;;  %v1573_v8 = vld [vmem:[#allocation2 + $0x2a8] sm:$0xff]  ;;  %v1575_v47 = vld [vmem:[#allocation2 + $0x320] sm:$0xff]  ;;  %v310_v50 = vadd.f32 %v309_v26, %v1567_v11  ;;  %v327_v49 = vadd.f32 %v326_v21, %v1569_v31 }
  0x3f   :  { %2651 = vst [vmem:[#allocation59_spill] sm:$0xff] %v1573_v8  ;;  %2652 = vst [vmem:[#allocation60_spill] sm:$0xff] %v1575_v47  ;;  %v1578_v41 = vld [vmem:[#allocation2 + $0x1f8] sm:$0xff]  ;;  %v1587_v20 = vld [vmem:[#allocation2 + $0x270] sm:$0xff] }
  0x40   :  { %v1596_v26 = vld [vmem:[#allocation2 + $0x2b0] sm:$0xff]  ;;  %v1598_v21 = vld [vmem:[#allocation2 + $0x328] sm:$0xff] }
  0x41   :  { %2655 = vst [vmem:[#allocation63_spill] sm:$0xff] %v1596_v26  ;;  %2656 = vst [vmem:[#allocation64_spill] sm:$0xff] %v1598_v21 }
  0x4f   :  { %215 = vadd.xlane.f32.xlu0 %v214_v40  ;;  %v300_v40 = vadd.f32 %v299_v2, %v1509_v39  ;;  %v258_v2 = vadd.f32 %v257_v30, %v1523_v48  ;;  %v1551_v39 = vld [vmem:[#allocation2 + $0x1b8] sm:$0xff]  ;;  %v284_v30 = vadd.f32 %v283_v14, %v1542_v56  ;;  %v276_v14 = vadd.f32 %v275_v9, %v1555_v29  ;;  %v1592_v9 = vld [vmem:[#allocation2 + $0x360] sm:$0xff] }
  0x50   :  { %2653 = vst [vmem:[#allocation61_spill] sm:$0xff] %v1592_v9 }
  0x51   :  { %v285_v54 = vadd.f32 %v284_v30, %v1571_v25  ;;  %v1609_v25 = vld [vmem:[#allocation2 + $0x2f0] sm:$0xff] }
  0x52   :  { %2657 = vst [vmem:[#allocation65_spill] sm:$0xff] %v1609_v25 }
  0x53   :  { %224 = vadd.xlane.f32.xlu0 %v223_v10  ;;  %v301_v10 = vadd.f32 %v300_v40, %v1544_v55  ;;  %v293_v40 = vadd.f32 %v292_v7, %v1564_v35  ;;  %v268_v55 = vadd.f32 %v267_v38, %v1551_v39  ;;  %v1594_v7 = vld [vmem:[#allocation2 + $0x238] sm:$0xff] }
  0x54   :  { %233 = vadd.xlane.f32.xlu1 %v232_v57  ;;  %v259_v57 = vadd.f32 %v258_v2, %v1553_v36  ;;  %v1590_v2 = vld [vmem:[#allocation2 + $0x2e8] sm:$0xff]  ;;  %2654 = vst [vmem:[#allocation62_spill] sm:$0xff] %v1594_v7 }
  0x55   :  { %v302_v56 = vadd.f32 %v301_v10, %v1573_v8  ;;  %v294_v38 = vadd.f32 %v293_v40, %v1587_v20  ;;  %v311_v30 = vadd.f32 %v310_v50, %v1590_v2  ;;  %v328_v10 = vadd.f32 %v327_v49, %v1592_v9  ;;  %v1606_v8 = vld [vmem:[#allocation2 + $0x278] sm:$0xff]  ;;  %v1615_v40 = vld [vmem:[#allocation2 + $0x330] sm:$0xff] }
  0x56   :  { %2660 = vst [vmem:[#allocation68_spill] sm:$0xff] %v1615_v40 }
  0x57   :  { %242 = vadd.xlane.f32.xlu0 %v241_v3  ;;  %v319_v3 = vadd.f32 %v318_v62, %v1575_v47  ;;  %v286_v62 = vadd.f32 %v285_v54, %v1594_v7  ;;  %v303_v47 = vadd.f32 %v302_v56, %v1596_v26  ;;  %v295_v49 = vadd.f32 %v294_v38, %v1606_v8  ;;  %v1626_v26 = vld [vmem:[#allocation2 + $0x338] sm:$0xff] }
  0x58   :  { %251 = vadd.xlane.f32.xlu1 %v250_v0  ;;  %v277_v0 = vadd.f32 %v276_v14, %v1578_v41  ;;  %v1613_v14 = vld [vmem:[#allocation2 + $0x2b8] sm:$0xff]  ;;  %2663 = vst [vmem:[#allocation71_spill] sm:$0xff] %v1626_v26 }
  0x59   :  { %v320_v31 = vadd.f32 %v319_v3, %v1598_v21  ;;  %2659 = vst [vmem:[#allocation67_spill] sm:$0xff] %v1613_v14  ;;  %v304_v56 = vadd.f32 %v303_v47, %v1613_v14  ;;  %v1622_v3 = vld [vmem:[#allocation2 + $0x2f8] sm:$0xff]  ;;  %v1624_v21 = vld [vmem:[#allocation2 + $0x370] sm:$0xff] }
  0x5a   :  { %2661 = vst [vmem:[#allocation69_spill] sm:$0xff] %v1622_v3  ;;  %2662 = vst [vmem:[#allocation70_spill] sm:$0xff] %v1624_v21 }
  0x5b   :  { %260 = vadd.xlane.f32.xlu0 %v259_v57  ;;  %v1611_v57 = vld [vmem:[#allocation2 + $0x368] sm:$0xff]  ;;  %v321_v50 = vadd.f32 %v320_v31, %v1615_v40  ;;  %v1225_v31 = vmov 0.0  }
  0x5c   :  { %269 = vadd.xlane.f32.xlu1 %v268_v55  ;;  %2658 = vst [vmem:[#allocation66_spill] sm:$0xff] %v1611_v57  ;;  %v312_v55 = vadd.f32 %v311_v30, %v1609_v25  ;;  %v329_v54 = vadd.f32 %v328_v10, %v1611_v57  ;;  %v1631_v10 = vld [vmem:[#allocation2 + $0x378] sm:$0xff]  ;;  %30 = vst.msk [vmem:[%s2520_s2] sm:$0xff] %vm29_vm0, %v1225_v31 }
  0x5d   :  { %v322_v30 = vadd.f32 %v321_v50, %v1626_v26  ;;  %2664 = vst [vmem:[#allocation72_spill] sm:$0xff] %v1631_v10  ;;  %31 = vst.msk [vmem:[%s2520_s2 + $0x8] sm:$0xff] %vm29_vm0, %v1225_v31 }
  0x5e   :  { %v330_v38 = vadd.f32 %v329_v54, %v1624_v21  ;;  %32 = vst.msk [vmem:[%s2520_s2 + $0x10] sm:$0xff] %vm29_vm0, %v1225_v31  ;;  %33 = vst.msk [vmem:[%s2520_s2 + $0x18] sm:$0xff] %vm29_vm0, %v1225_v31  ;;  %v1702_v54 = vld [vmem:[#allocation2 + $0x388] sm:$0xff]  ;;  %v1743_v21 = vld [vmem:[#allocation2 + $0x3d0] sm:$0xff] }
  0x5f   :  { %278 = vadd.xlane.f32.xlu0 %v277_v0  ;;  %v313_v0 = vadd.f32 %v312_v55, %v1622_v3  ;;  %34 = vst.msk [vmem:[%s2520_s2 + $0x20] sm:$0xff] %vm29_vm0, %v1225_v31  ;;  %35 = vst.msk [vmem:[%s2520_s2 + $0x28] sm:$0xff] %vm29_vm0, %v1225_v31  ;;  %v1700_v55 = vld [vmem:[#allocation2 + $0x380] sm:$0xff] }
  0x60   :  { %287 = vadd.xlane.f32.xlu1 %v286_v62  ;;  %v331_v47 = vadd.f32 %v330_v38, %v1631_v10  ;;  %36 = vst.msk [vmem:[%s2520_s2 + $0x30] sm:$0xff] %vm29_vm0, %v1225_v31  ;;  %37 = vst.msk [vmem:[%s2520_s2 + $0x38] sm:$0xff] %vm29_vm0, %v1225_v31  ;;  %v468_v62 = vlaneseq }
  0x61   :  { %38 = vst.msk [vmem:[%s2520_s2 + $0x40] sm:$0xff] %vm29_vm0, %v1225_v31  ;;  %39 = vst.msk [vmem:[%s2520_s2 + $0x48] sm:$0xff] %vm29_vm0, %v1225_v31 }
  0x62   :  { %40 = vst.msk [vmem:[%s2520_s2 + $0x50] sm:$0xff] %vm29_vm0, %v1225_v31  ;;  %41 = vst.msk [vmem:[%s2520_s2 + $0x58] sm:$0xff] %vm29_vm0, %v1225_v31 }
  0x63   :  { %296 = vadd.xlane.f32.xlu0 %v295_v49  ;;  %42 = vst.msk [vmem:[%s2520_s2 + $0x60] sm:$0xff] %vm29_vm0, %v1225_v31  ;;  %43 = vst.msk [vmem:[%s2520_s2 + $0x68] sm:$0xff] %vm29_vm0, %v1225_v31  ;;  %v1698_v49 = vand.u32 127, %v468_v62 }
  0x64   :  { %305 = vadd.xlane.f32.xlu1 %v304_v56  ;;  %44 = vst.msk [vmem:[%s2520_s2 + $0x70] sm:$0xff] %vm29_vm0, %v1225_v31  ;;  %45 = vst.msk [vmem:[%s2520_s2 + $0x78] sm:$0xff] %vm29_vm0, %v1225_v31  ;;  %v334_v56 = vadd.f32 %v1702_v54, %v1700_v55  ;;  %v1717_v31 = vld [vmem:[#allocation2 + $0x3c8] sm:$0xff] }
  0x65   :  { %2665 = vst [vmem:[#allocation73_spill] sm:$0xff] %v1700_v55  ;;  %2666 = vst [vmem:[#allocation74_spill] sm:$0xff] %v1702_v54  ;;  %v1707_v50 = vadd.s32 128, %v1698_v49  ;;  %v1722_v40 = vadd.s32 384, %v1698_v49  ;;  %v1727_v55 = vadd.s32 512, %v1698_v49  ;;  %v1737_v14 = vadd.s32 768, %v1698_v49 }
  0x66   :  { %2669 = vst [vmem:[#allocation77_spill] sm:$0xff] %v1717_v31  ;;  %2671 = vst [vmem:[#allocation79_spill] sm:$0xff] %v1743_v21  ;;  %v1746_v9 = vadd.s32 896, %v1698_v49 }
  0x67   :  { %314 = vadd.xlane.f32.xlu0 %v313_v0  ;;  %v1709_v0 = vld [vmem:[#allocation2 + $0x390] sm:$0xff] }
  0x68   :  { %323 = vadd.xlane.f32.xlu1 %v322_v30  ;;  %2667 = vst [vmem:[#allocation75_spill] sm:$0xff] %v1709_v0  ;;  %v335_v38 = vadd.f32 %v334_v56, %v1709_v0  ;;  %v1713_v30 = vadd.s32 256, %v1698_v49  ;;  %v1731_v56 = vld [vmem:[#allocation2 + $0x398] sm:$0xff]  ;;  %v1734_v0 = vadd.s32 640, %v1698_v49 }
  0x69   :  { %2670 = vst [vmem:[#allocation78_spill] sm:$0xff] %v1731_v56 }
  0x6a   :  { %v336_v10 = vadd.f32 %v335_v38, %v1731_v56 }
  0x6b   :  { %332 = vadd.xlane.f32.xlu0 %v331_v47  ;;  %v1715_v47 = vld [vmem:[#allocation2 + $0x3c0] sm:$0xff] }
  0x6c   :  { %2668 = vst [vmem:[#allocation76_spill] sm:$0xff] %v1715_v47  ;;  %v343_v54 = vadd.f32 %v1717_v31, %v1715_v47 }
  0x6e   :  { %v344_v7 = vadd.f32 %v343_v54, %v1743_v21  ;;  %v1766_v21 = vld [vmem:[#allocation2 + $0x3d8] sm:$0xff] }
  0x93   :  { %v1719_v62 = vpop.permute.xlu1 %484  ;;  %v479_v26 = vpop.permute.xlu0 %478 }
  0x94   :  { %vm525_vm1 = vcmp.eq.s32.totalorder %v1698_v49, %v479_v26  ;;  %vm526_vm2 = vcmp.eq.s32.totalorder %v1707_v50, %v479_v26  ;;  %vm527_vm3 = vcmp.eq.s32.totalorder %v1713_v30, %v479_v26  ;;  %vm528_vm4 = vcmp.eq.s32.totalorder %v1722_v40, %v479_v26 }
  0x95   :  { %v653_v31 = vsel %vm525_vm1, %v1301_v17, 0.0  ;;  %v654_v47 = vsel %vm526_vm2, %v1303_v18, 0.0  ;;  %vm529_vm5 = vcmp.eq.s32.totalorder %v1727_v55, %v479_v26  ;;  %v1753_v17 = vld [vmem:[#allocation2 + $0x3a0] sm:$0xff]  ;;  %vm530_vm8 = vcmp.eq.s32.totalorder %v1734_v0, %v479_v26 }
  0x96   :  { %v781_v3 = vadd.f32 %v654_v47, %v653_v31  ;;  %2672 = vst [vmem:[#allocation80_spill] sm:$0xff] %v1753_v17  ;;  %vm531_vm9 = vcmp.eq.s32.totalorder %v1737_v14, %v479_v26  ;;  %v655_v18 = vsel %vm527_vm3, %v1315_v24, 0.0  ;;  %v1759_v38 = vadd.f32 %v336_v10, %v1753_v17 }
  0x97   :  { %v488_v57 = vpop.permute.xlu1 %487  ;;  %v1761_v56 = vpop.permute.xlu0 %481  ;;  %vm532_vm11 = vcmp.eq.s32.totalorder %v1746_v9, %v479_v26  ;;  %v656_v24 = vsel %vm528_vm4, %v1334_v34, 0.0  ;;  %v657_v10 = vsel %vm529_vm5, %v1355_v46, 0.0  ;;  %v659_v17 = vsel %vm531_vm9, %v1393_v4, 0.0 }
  0x98   :  { %vm549_vm6 = vcmp.eq.s32.totalorder %v1698_v49, %v488_v57  ;;  %vm550_vm7 = vcmp.eq.s32.totalorder %v1707_v50, %v488_v57  ;;  %v782_v54 = vadd.f32 %v781_v3, %v655_v18  ;;  %vm551_vm10 = vcmp.eq.s32.totalorder %v1713_v30, %v488_v57 }
  0x99   :  { %v677_v47 = vsel %vm549_vm6, %v1330_v32, 0.0  ;;  %v678_v31 = vsel %vm550_vm7, %v1332_v33, 0.0  ;;  %v1776_v3 = vadd.f32 %v344_v7, %v1766_v21  ;;  %v658_v18 = vsel %vm530_vm8, %v1378_v60, 0.0 }
  0x9a   :  { %v783_v32 = vadd.f32 %v782_v54, %v656_v24  ;;  %vm552_vm12 = vcmp.eq.s32.totalorder %v1722_v40, %v488_v57  ;;  %v808_v33 = vadd.f32 %v678_v31, %v677_v47  ;;  %v679_v25 = vsel %vm551_vm10, %v1349_v43, 0.0 }
  0x9b   :  { %vm533_vm13 = vcmp.eq.s32.totalorder %v1698_v49, %v1761_v56  ;;  %vm534_vm14 = vcmp.eq.s32.totalorder %v1707_v50, %v1761_v56  ;;  %vm553_vm15 = vcmp.eq.s32.totalorder %v1727_v55, %v488_v57  ;;  %vm554_vm1 = vcmp.eq.s32.totalorder %v1734_v0, %v488_v57  ;;  %v1790_v60 = vpop.permute.xlu1 %493 }
  0x9c   :  { %v784_v34 = vadd.f32 %v783_v32, %v657_v10  ;;  %v809_v46 = vadd.f32 %v808_v33, %v679_v25  ;;  %v660_v4 = vsel %vm532_vm11, %v1432_v52, 0.0  ;;  %v680_v43 = vsel %vm552_vm12, %v1374_v58, 0.0 }
  0x9d   :  { %v661_v7 = vsel %vm533_vm13, %v1311_v22, 0.0  ;;  %v662_v54 = vsel %vm534_vm14, %v1313_v23, 0.0  ;;  %vm555_vm2 = vcmp.eq.s32.totalorder %v1737_v14, %v488_v57  ;;  %vm535_vm3 = vcmp.eq.s32.totalorder %v1713_v30, %v1761_v56 }
  0x9e   :  { %v785_v47 = vadd.f32 %v784_v34, %v658_v18  ;;  %v810_v31 = vadd.f32 %v809_v46, %v680_v43  ;;  %vm556_vm4 = vcmp.eq.s32.totalorder %v1746_v9, %v488_v57  ;;  %v681_v25 = vsel %vm553_vm15, %v1406_v13, 0.0 }
  0x9f   :  { %v682_v26 = vsel %vm554_vm1, %v1440_v61, 0.0  ;;  %vm536_vm5 = vcmp.eq.s32.totalorder %v1722_v40, %v1761_v56  ;;  %v790_v52 = vadd.f32 %v662_v54, %v661_v7  ;;  %vm565_vm6 = vcmp.eq.s32.totalorder %v1698_v49, %v1790_v60  ;;  %v2673_v7 = vld [vmem:[#allocation5_spill] sm:$0xff] }
  0xa0   :  { %v786_v58 = vadd.f32 %v785_v47, %v659_v17  ;;  %v811_v22 = vadd.f32 %v810_v31, %v681_v25  ;;  %v683_v23 = vsel %vm555_vm2, %v1479_v42, 0.0  ;;  %vm537_vm7 = vcmp.eq.s32.totalorder %v1727_v55, %v1761_v56  ;;  %v2674_v25 = vld [vmem:[#allocation6_spill] sm:$0xff] }
  0xa1   :  { %v663_v24 = vsel %vm535_vm3, %v1321_v27, 0.0  ;;  %vm566_vm8 = vcmp.eq.s32.totalorder %v1707_v50, %v1790_v60  ;;  %vm538_vm9 = vcmp.eq.s32.totalorder %v1734_v0, %v1761_v56  ;;  %v684_v10 = vsel %vm556_vm4, %v1517_v12, 0.0 }
  0xa2   :  { %v787_v13 = vadd.f32 %v786_v58, %v660_v4  ;;  %v812_v61 = vadd.f32 %v811_v22, %v682_v26  ;;  %v791_v17 = vadd.f32 %v790_v52, %v663_v24  ;;  %v664_v42 = vsel %vm536_vm5, %v1339_v37, 0.0  ;;  %v1847_v4 = vpop.permute.xlu1 %499  ;;  %v2676_v58 = vld [vmem:[#allocation9_spill] sm:$0xff] }
  0xa3   :  { %v693_v18 = vsel %vm565_vm6, %v1351_v44, 0.0  ;;  %v694_v32 = vsel %vm566_vm8, %v1353_v45, 0.0  ;;  %vm539_vm10 = vcmp.eq.s32.totalorder %v1737_v14, %v1761_v56  ;;  %vm567_vm11 = vcmp.eq.s32.totalorder %v1713_v30, %v1790_v60 }
  0xa4   :  { %788 = vadd.xlane.f32.xlu1 %v787_v13  ;;  %v813_v27 = vadd.f32 %v812_v61, %v683_v23  ;;  %v792_v33 = vadd.f32 %v791_v17, %v664_v42  ;;  %vm540_vm12 = vcmp.eq.s32.totalorder %v1746_v9, %v1761_v56  ;;  %v665_v37 = vsel %vm537_vm7, %v1364_v51, 0.0  ;;  %v1875_v61 = vld [vmem:[#allocation2 + $0x3a8] sm:$0xff] }
  0xa5   :  { %v666_v44 = vsel %vm538_vm9, %v1397_v6, 0.0  ;;  %vm568_vm13 = vcmp.eq.s32.totalorder %v1722_v40, %v1790_v60  ;;  %v826_v57 = vadd.f32 %v694_v32, %v693_v18  ;;  %vm541_vm14 = vcmp.eq.s32.totalorder %v1698_v49, %v1719_v62  ;;  %v2678_v32 = vld [vmem:[#allocation15_spill] sm:$0xff] }
  0xa6   :  { %v814_v45 = vadd.f32 %v813_v27, %v684_v10  ;;  %v793_v12 = vadd.f32 %v792_v33, %v665_v37  ;;  %v667_v34 = vsel %vm539_vm10, %v1434_v53, 0.0  ;;  %v695_v46 = vsel %vm567_vm11, %v1376_v59, 0.0  ;;  %v2679_v33 = vld [vmem:[#allocation16_spill] sm:$0xff] }
  0xa7   :  { %vm542_vm15 = vcmp.eq.s32.totalorder %v1707_v50, %v1719_v62  ;;  %vm543_vm1 = vcmp.eq.s32.totalorder %v1713_v30, %v1719_v62  ;;  %vm569_vm2 = vcmp.eq.s32.totalorder %v1727_v55, %v1790_v60  ;;  %v827_v6 = vadd.f32 %v826_v57, %v695_v46 }
  0xa8   :  { %815 = vadd.xlane.f32.xlu1 %v814_v45  ;;  %v794_v51 = vadd.f32 %v793_v12, %v666_v44  ;;  %vm544_vm3 = vcmp.eq.s32.totalorder %v1722_v40, %v1719_v62  ;;  %v668_v59 = vsel %vm540_vm12, %v1473_v5, 0.0  ;;  %v696_v53 = vsel %vm568_vm13, %v1410_v15, 0.0  ;;  %v2675_v5 = vld [vmem:[#allocation32_spill] sm:$0xff]  ;;  %v2680_v45 = vld [vmem:[#allocation13_spill] sm:$0xff] }
  0xa9   :  { %v669_v43 = vsel %vm541_vm14, %v1305_v19, 0.0  ;;  %v670_v54 = vsel %vm542_vm15, %v2673_v7, 0.0  ;;  %vm570_vm4 = vcmp.eq.s32.totalorder %v1734_v0, %v1790_v60  ;;  %v828_v31 = vadd.f32 %v827_v6, %v696_v53  ;;  %v2677_v19 = vld [vmem:[#allocation43_spill] sm:$0xff]  ;;  %v2681_v12 = vld [vmem:[#allocation20_spill] sm:$0xff] }
  0xaa   :  { %v795_v47 = vadd.f32 %v794_v51, %v667_v34  ;;  %v671_v26 = vsel %vm543_vm1, %v2674_v25, 0.0  ;;  %vm571_vm5 = vcmp.eq.s32.totalorder %v1737_v14, %v1790_v60  ;;  %v697_v56 = vsel %vm569_vm2, %v2675_v5, 0.0  ;;  %v2682_v6 = vld [vmem:[#allocation24_spill] sm:$0xff] }
  0xab   :  { %v672_v22 = vsel %vm544_vm3, %v2676_v58, 0.0  ;;  %v799_v52 = vadd.f32 %v670_v54, %v669_v43  ;;  %v829_v23 = vadd.f32 %v828_v31, %v697_v56  ;;  %vm581_vm6 = vcmp.eq.s32.totalorder %v1698_v49, %v1847_v4  ;;  %v2683_v43 = vld [vmem:[#allocation23_spill] sm:$0xff]  ;;  %v2684_v54 = vld [vmem:[#allocation34_spill] sm:$0xff] }
  0xac   :  { %v796_v15 = vadd.f32 %v795_v47, %v668_v59  ;;  %vm582_vm7 = vcmp.eq.s32.totalorder %v1707_v50, %v1847_v4  ;;  %vm572_vm8 = vcmp.eq.s32.totalorder %v1746_v9, %v1790_v60  ;;  %v698_v24 = vsel %vm570_vm4, %v2677_v19, 0.0  ;;  %v1884_v60 = vpop.permute.xlu0 %490  ;;  %v2685_v31 = vld [vmem:[#allocation7_spill] sm:$0xff] }
  0xad   :  { %vm545_vm9 = vcmp.eq.s32.totalorder %v1727_v55, %v1719_v62  ;;  %v800_v13 = vadd.f32 %v799_v52, %v671_v26  ;;  %v699_v17 = vsel %vm571_vm5, %v1523_v48, 0.0  ;;  %v830_v10 = vadd.f32 %v829_v23, %v698_v24  ;;  %v1914_v26 = vpop.permute.xlu1 %505 }
  0xae   :  { %797 = vadd.xlane.f32.xlu0 %v796_v15  ;;  %vm546_vm10 = vcmp.eq.s32.totalorder %v1734_v0, %v1719_v62  ;;  %v1882_v42 = vadd.f32 %v1759_v38, %v1875_v61  ;;  %vm583_vm11 = vcmp.eq.s32.totalorder %v1713_v30, %v1847_v4  ;;  %v709_v27 = vsel %vm581_vm6, %v2678_v32, 0.0 }
  0xaf   :  { %v801_v18 = vadd.f32 %v800_v13, %v672_v22  ;;  %v710_v37 = vsel %vm582_vm7, %v2679_v33, 0.0  ;;  %v700_v48 = vsel %vm572_vm8, %v1553_v36, 0.0  ;;  %v831_v44 = vadd.f32 %v830_v10, %v699_v17  ;;  %v2687_v22 = vld [vmem:[#allocation35_spill] sm:$0xff]  ;;  %v2688_v17 = vld [vmem:[#allocation10_spill] sm:$0xff] }
  0xb0   :  { %vm547_vm12 = vcmp.eq.s32.totalorder %v1737_v14, %v1719_v62  ;;  %v673_v38 = vsel %vm545_vm9, %v2680_v45, 0.0  ;;  %v674_v57 = vsel %vm546_vm10, %v2681_v12, 0.0  ;;  %vm584_vm13 = vcmp.eq.s32.totalorder %v1722_v40, %v1847_v4 }
  0xb1   :  { %v802_v34 = vadd.f32 %v801_v18, %v673_v38  ;;  %v844_v46 = vadd.f32 %v710_v37, %v709_v27  ;;  %v832_v51 = vadd.f32 %v831_v44, %v700_v48  ;;  %v711_v59 = vsel %vm583_vm11, %v2682_v6, 0.0  ;;  %v1939_v27 = vpop.permute.xlu0 %496  ;;  %v2690_v37 = vld [vmem:[#allocation25_spill] sm:$0xff]  ;;  %v2691_v44 = vld [vmem:[#allocation26_spill] sm:$0xff] }
  0xb2   :  { %vm557_vm14 = vcmp.eq.s32.totalorder %v1698_v49, %v1884_v60  ;;  %vm558_vm15 = vcmp.eq.s32.totalorder %v1707_v50, %v1884_v60  ;;  %vm548_vm1 = vcmp.eq.s32.totalorder %v1746_v9, %v1719_v62  ;;  %vm585_vm2 = vcmp.eq.s32.totalorder %v1727_v55, %v1847_v4  ;;  %v2686_v62 = vld [vmem:[#allocation8_spill] sm:$0xff] }
  0xb3   :  { %v803_v36 = vadd.f32 %v802_v34, %v674_v57  ;;  %v845_v53 = vadd.f32 %v844_v46, %v711_v59  ;;  %833 = vadd.xlane.f32.xlu1 %v832_v51  ;;  %v675_v7 = vsel %vm547_vm12, %v2683_v43, 0.0  ;;  %vm586_vm3 = vcmp.eq.s32.totalorder %v1734_v0, %v1847_v4  ;;  %v2692_v57 = vld [vmem:[#allocation21_spill] sm:$0xff]  ;;  %v2693_v59 = vld [vmem:[#allocation30_spill] sm:$0xff] }
  0xb4   :  { %v712_v47 = vsel %vm584_vm13, %v2684_v54, 0.0  ;;  %v685_v25 = vsel %vm557_vm14, %v2685_v31, 0.0  ;;  %vm559_vm4 = vcmp.eq.s32.totalorder %v1713_v30, %v1884_v60  ;;  %v686_v58 = vsel %vm558_vm15, %v2686_v62, 0.0  ;;  %v2696_v31 = vld [vmem:[#allocation51_spill] sm:$0xff] }
  0xb5   :  { %v804_v5 = vadd.f32 %v803_v36, %v675_v7  ;;  %v846_v56 = vadd.f32 %v845_v53, %v712_v47  ;;  %v676_v52 = vsel %vm548_vm1, %v2687_v22, 0.0  ;;  %vm587_vm5 = vcmp.eq.s32.totalorder %v1737_v14, %v1847_v4  ;;  %v2695_v53 = vld [vmem:[#allocation36_spill] sm:$0xff]  ;;  %v1973_v47 = vpop.permute.xlu1 %511  ;;  %v2698_v62 = vld [vmem:[#allocation11_spill] sm:$0xff] }
  0xb6   :  { %vm588_vm6 = vcmp.eq.s32.totalorder %v1746_v9, %v1847_v4  ;;  %v713_v15 = vsel %vm585_vm2, %v1488_v63, 0.0  ;;  %vm560_vm7 = vcmp.eq.s32.totalorder %v1722_v40, %v1884_v60  ;;  %v817_v24 = vadd.f32 %v686_v58, %v685_v25  ;;  %v2699_v22 = vld [vmem:[#allocation12_spill] sm:$0xff] }
  0xb7   :  { %v805_v23 = vadd.f32 %v804_v5, %v676_v52  ;;  %v847_v19 = vadd.f32 %v846_v56, %v713_v15  ;;  %v714_v13 = vsel %vm586_vm3, %v1525_v1, 0.0  ;;  %v687_v10 = vsel %vm559_vm4, %v2688_v17, 0.0  ;;  %v2689_v1 = vld [vmem:[#allocation14_spill] sm:$0xff]  ;;  %v2697_v5 = vld [vmem:[#allocation44_spill] sm:$0xff] }
  0xb8   :  { %vm597_vm8 = vcmp.eq.s32.totalorder %v1698_v49, %v1914_v26  ;;  %vm598_vm9 = vcmp.eq.s32.totalorder %v1707_v50, %v1914_v26  ;;  %v715_v63 = vsel %vm587_vm5, %v1555_v29, 0.0  ;;  %vm561_vm10 = vcmp.eq.s32.totalorder %v1727_v55, %v1884_v60 }
  0xb9   :  { %806 = vadd.xlane.f32.xlu0 %v805_v23  ;;  %v848_v18 = vadd.f32 %v847_v19, %v714_v13  ;;  %v818_v32 = vadd.f32 %v817_v24, %v687_v10  ;;  %vm562_vm11 = vcmp.eq.s32.totalorder %v1734_v0, %v1884_v60  ;;  %v688_v33 = vsel %vm560_vm7, %v2689_v1, 0.0  ;;  %v2700_v19 = vld [vmem:[#allocation17_spill] sm:$0xff]  ;;  %v2701_v1 = vld [vmem:[#allocation22_spill] sm:$0xff] }
  0xba   :  { %v725_v48 = vsel %vm597_vm8, %v2690_v37, 0.0  ;;  %v726_v45 = vsel %vm598_vm9, %v2691_v44, 0.0  ;;  %vm563_vm12 = vcmp.eq.s32.totalorder %v1737_v14, %v1884_v60  ;;  %vm599_vm13 = vcmp.eq.s32.totalorder %v1713_v30, %v1914_v26  ;;  %v2006_v37 = vpop.permute.xlu0 %502  ;;  %v2703_v44 = vld [vmem:[#allocation38_spill] sm:$0xff] }
  0xbb   :  { %v849_v38 = vadd.f32 %v848_v18, %v715_v63  ;;  %v819_v29 = vadd.f32 %v818_v32, %v688_v33  ;;  %v716_v12 = vsel %vm588_vm6, %v1578_v41, 0.0  ;;  %vm564_vm14 = vcmp.eq.s32.totalorder %v1746_v9, %v1884_v60  ;;  %v2694_v41 = vld [vmem:[#allocation41_spill] sm:$0xff] }
  0xbc   :  { %v689_v34 = vsel %vm561_vm10, %v2692_v57, 0.0  ;;  %vm600_vm15 = vcmp.eq.s32.totalorder %v1722_v40, %v1914_v26  ;;  %v862_v6 = vadd.f32 %v726_v45, %v725_v48  ;;  %vm573_vm1 = vcmp.eq.s32.totalorder %v1698_v49, %v1939_v27  ;;  %v2705_v57 = vld [vmem:[#allocation42_spill] sm:$0xff] }
  0xbd   :  { %v850_v46 = vadd.f32 %v849_v38, %v716_v12  ;;  %v820_v51 = vadd.f32 %v819_v29, %v689_v34  ;;  %v690_v4 = vsel %vm562_vm11, %v2693_v59, 0.0  ;;  %v691_v36 = vsel %vm563_vm12, %v2694_v41, 0.0  ;;  %v2706_v59 = vld [vmem:[#allocation45_spill] sm:$0xff] }
  0xbe   :  { %v727_v43 = vsel %vm599_vm13, %v2695_v53, 0.0  ;;  %vm574_vm2 = vcmp.eq.s32.totalorder %v1707_v50, %v1939_v27  ;;  %vm601_vm3 = vcmp.eq.s32.totalorder %v1727_v55, %v1914_v26  ;;  %vm575_vm4 = vcmp.eq.s32.totalorder %v1713_v30, %v1939_v27  ;;  %v2707_v53 = vld [vmem:[#allocation52_spill] sm:$0xff] }
  0xbf   :  { %851 = vadd.xlane.f32.xlu1 %v850_v46  ;;  %v821_v7 = vadd.f32 %v820_v51, %v690_v4  ;;  %v863_v54 = vadd.f32 %v862_v6, %v727_v43  ;;  %v692_v25 = vsel %vm564_vm14, %v2696_v31, 0.0  ;;  %v728_v56 = vsel %vm600_vm15, %v2697_v5, 0.0  ;;  %v2033_v31 = vpop.permute.xlu1 %517 }
  0xc0   :  { %v701_v58 = vsel %vm573_vm1, %v2698_v62, 0.0  ;;  %v702_v52 = vsel %vm574_vm2, %v2699_v22, 0.0  ;;  %vm602_vm5 = vcmp.eq.s32.totalorder %v1734_v0, %v1914_v26  ;;  %vm603_vm6 = vcmp.eq.s32.totalorder %v1737_v14, %v1914_v26 }
  0xc1   :  { %v822_v15 = vadd.f32 %v821_v7, %v691_v36  ;;  %v864_v23 = vadd.f32 %v863_v54, %v728_v56  ;;  %v729_v60 = vsel %vm601_vm3, %v1535_v28, 0.0  ;;  %vm576_vm7 = vcmp.eq.s32.totalorder %v1722_v40, %v1939_v27  ;;  %v2708_v7 = vld [vmem:[#allocation18_spill] sm:$0xff] }
  0xc2   :  { %v703_v24 = vsel %vm575_vm4, %v2700_v19, 0.0  ;;  %v835_v13 = vadd.f32 %v702_v52, %v701_v58  ;;  %vm613_vm8 = vcmp.eq.s32.totalorder %v1698_v49, %v1973_v47  ;;  %vm614_vm9 = vcmp.eq.s32.totalorder %v1707_v50, %v1973_v47 }
  0xc3   :  { %v823_v17 = vadd.f32 %v822_v15, %v692_v25  ;;  %v865_v10 = vadd.f32 %v864_v23, %v729_v60  ;;  %vm604_vm10 = vcmp.eq.s32.totalorder %v1746_v9, %v1914_v26  ;;  %v730_v63 = vsel %vm602_vm5, %v1564_v35, 0.0  ;;  %v2702_v35 = vld [vmem:[#allocation37_spill] sm:$0xff] }
  0xc4   :  { %vm577_vm11 = vcmp.eq.s32.totalorder %v1727_v55, %v1939_v27  ;;  %v836_v28 = vadd.f32 %v835_v13, %v703_v24  ;;  %v731_v18 = vsel %vm603_vm6, %v1587_v20, 0.0  ;;  %vm578_vm12 = vcmp.eq.s32.totalorder %v1734_v0, %v1939_v27  ;;  %v2704_v20 = vld [vmem:[#allocation31_spill] sm:$0xff]  ;;  %v2058_v13 = vpop.permute.xlu0 %508 }
  0xc5   :  { %824 = vadd.xlane.f32.xlu0 %v823_v17  ;;  %v866_v32 = vadd.f32 %v865_v10, %v730_v63  ;;  %v704_v33 = vsel %vm576_vm7, %v2701_v1, 0.0  ;;  %vm615_vm13 = vcmp.eq.s32.totalorder %v1713_v30, %v1973_v47  ;;  %v741_v26 = vsel %vm613_vm8, %v2702_v35, 0.0  ;;  %v2713_v10 = vld [vmem:[#allocation46_spill] sm:$0xff]  ;;  %v2716_v35 = vld [vmem:[#allocation48_spill] sm:$0xff] }
  0xc6   :  { %v837_v48 = vadd.f32 %v836_v28, %v704_v33  ;;  %v742_v45 = vsel %vm614_vm9, %v2703_v44, 0.0  ;;  %v732_v38 = vsel %vm604_vm10, %v1606_v8, 0.0  ;;  %vm579_vm14 = vcmp.eq.s32.totalorder %v1737_v14, %v1939_v27  ;;  %v2714_v28 = vld [vmem:[#allocation47_spill] sm:$0xff]  ;;  %v2715_v33 = vld [vmem:[#allocation69_spill] sm:$0xff] }
  0xc7   :  { %v867_v29 = vadd.f32 %v866_v32, %v731_v18  ;;  %v705_v12 = vsel %vm577_vm11, %v2704_v20, 0.0  ;;  %v706_v34 = vsel %vm578_vm12, %v2705_v57, 0.0  ;;  %vm616_vm15 = vcmp.eq.s32.totalorder %v1722_v40, %v1973_v47  ;;  %v2718_v20 = vld [vmem:[#allocation58_spill] sm:$0xff]  ;;  %v2719_v57 = vld [vmem:[#allocation53_spill] sm:$0xff] }
  0xc8   :  { %v838_v46 = vadd.f32 %v837_v48, %v705_v12  ;;  %v880_v51 = vadd.f32 %v742_v45, %v741_v26  ;;  %v743_v4 = vsel %vm615_vm13, %v2706_v59, 0.0  ;;  %vm589_vm1 = vcmp.eq.s32.totalorder %v1698_v49, %v2006_v37  ;;  %v2720_v59 = vld [vmem:[#allocation62_spill] sm:$0xff] }
  0xc9   :  { %v868_v6 = vadd.f32 %v867_v29, %v732_v38  ;;  %vm590_vm2 = vcmp.eq.s32.totalorder %v1707_v50, %v2006_v37  ;;  %vm580_vm3 = vcmp.eq.s32.totalorder %v1746_v9, %v1939_v27  ;;  %vm617_vm4 = vcmp.eq.s32.totalorder %v1727_v55, %v1973_v47  ;;  %v2709_v27 = vld [vmem:[#allocation19_spill] sm:$0xff]  ;;  %v2717_v29 = vld [vmem:[#allocation54_spill] sm:$0xff] }
  0xca   :  { %v839_v8 = vadd.f32 %v838_v46, %v706_v34  ;;  %v881_v41 = vadd.f32 %v880_v51, %v743_v4  ;;  %v707_v36 = vsel %vm579_vm14, %v1521_v16, 0.0  ;;  %vm618_vm5 = vcmp.eq.s32.totalorder %v1734_v0, %v1973_v47 }
  0xcb   :  { %869 = vadd.xlane.f32.xlu1 %v868_v6  ;;  %v744_v43 = vsel %vm616_vm15, %v2707_v53, 0.0  ;;  %v717_v54 = vsel %vm589_vm1, %v2708_v7, 0.0  ;;  %vm591_vm6 = vcmp.eq.s32.totalorder %v1713_v30, %v2006_v37  ;;  %v718_v56 = vsel %vm590_vm2, %v2709_v27, 0.0  ;;  %v2092_v6 = vpop.permute.xlu1 %523  ;;  %v2725_v27 = vld [vmem:[#allocation39_spill] sm:$0xff] }
  0xcc   :  { %v840_v25 = vadd.f32 %v839_v8, %v707_v36  ;;  %v882_v5 = vadd.f32 %v881_v41, %v744_v43  ;;  %v708_v62 = vsel %vm580_vm3, %v1551_v39, 0.0  ;;  %vm619_vm7 = vcmp.eq.s32.totalorder %v1737_v14, %v1973_v47  ;;  %v2710_v39 = vld [vmem:[#allocation27_spill] sm:$0xff]  ;;  %v2721_v8 = vld [vmem:[#allocation57_spill] sm:$0xff]  ;;  %v2722_v36 = vld [vmem:[#allocation28_spill] sm:$0xff] }
  0xcd   :  { %vm620_vm8 = vcmp.eq.s32.totalorder %v1746_v9, %v1973_v47  ;;  %v745_v16 = vsel %vm617_vm4, %v1567_v11, 0.0  ;;  %vm592_vm9 = vcmp.eq.s32.totalorder %v1722_v40, %v2006_v37  ;;  %v853_v52 = vadd.f32 %v718_v56, %v717_v54  ;;  %v2711_v11 = vld [vmem:[#allocation65_spill] sm:$0xff] }
  0xce   :  { %v841_v58 = vadd.f32 %v840_v25, %v708_v62  ;;  %v883_v22 = vadd.f32 %v882_v5, %v745_v16  ;;  %v746_v15 = vsel %vm618_vm5, %v1590_v2, 0.0  ;;  %v719_v23 = vsel %vm591_vm6, %v2710_v39, 0.0  ;;  %v2712_v2 = vld [vmem:[#allocation33_spill] sm:$0xff]  ;;  %v2727_v39 = vld [vmem:[#allocation70_spill] sm:$0xff] }
  0xcf   :  { %vm629_vm10 = vcmp.eq.s32.totalorder %v1698_v49, %v2033_v31  ;;  %vm630_vm11 = vcmp.eq.s32.totalorder %v1707_v50, %v2033_v31  ;;  %v747_v60 = vsel %vm619_vm7, %v2711_v11, 0.0  ;;  %vm593_vm12 = vcmp.eq.s32.totalorder %v1727_v55, %v2006_v37  ;;  %v2723_v43 = vld [vmem:[#allocation29_spill] sm:$0xff] }
  0xd0   :  { %842 = vadd.xlane.f32.xlu0 %v841_v58  ;;  %v884_v19 = vadd.f32 %v883_v22, %v746_v15  ;;  %v854_v24 = vadd.f32 %v853_v52, %v719_v23  ;;  %vm594_vm13 = vcmp.eq.s32.totalorder %v1734_v0, %v2006_v37  ;;  %v720_v17 = vsel %vm592_vm9, %v2712_v2, 0.0  ;;  %v2724_v5 = vld [vmem:[#allocation61_spill] sm:$0xff]  ;;  %v2726_v22 = vld [vmem:[#allocation66_spill] sm:$0xff] }
  0xd1   :  { %v757_v63 = vsel %vm629_vm10, %v2713_v10, 0.0  ;;  %v758_v18 = vsel %vm630_vm11, %v2714_v28, 0.0  ;;  %vm595_vm14 = vcmp.eq.s32.totalorder %v1737_v14, %v2006_v37  ;;  %vm631_vm15 = vcmp.eq.s32.totalorder %v1713_v30, %v2033_v31  ;;  %v2730_v10 = vld [vmem:[#allocation77_spill] sm:$0xff]  ;;  %v2731_v28 = vld [vmem:[#allocation72_spill] sm:$0xff] }
  0xd2   :  { %v885_v32 = vadd.f32 %v884_v19, %v747_v60  ;;  %v855_v1 = vadd.f32 %v854_v24, %v720_v17  ;;  %v748_v48 = vsel %vm620_vm8, %v2715_v33, 0.0  ;;  %vm596_vm1 = vcmp.eq.s32.totalorder %v1746_v9, %v2006_v37  ;;  %v2728_v60 = vld [vmem:[#allocation49_spill] sm:$0xff]  ;;  %v2125_v24 = vpop.permute.xlu0 %514 }
  0xd3   :  { %v721_v26 = vsel %vm593_vm12, %v2716_v35, 0.0  ;;  %vm632_vm2 = vcmp.eq.s32.totalorder %v1722_v40, %v2033_v31  ;;  %v898_v38 = vadd.f32 %v758_v18, %v757_v63  ;;  %vm605_vm3 = vcmp.eq.s32.totalorder %v1698_v49, %v2058_v13 }
  0xd4   :  { %v886_v44 = vadd.f32 %v885_v32, %v748_v48  ;;  %v856_v45 = vadd.f32 %v855_v1, %v721_v26  ;;  %v722_v47 = vsel %vm594_vm13, %v2717_v29, 0.0  ;;  %v723_v12 = vsel %vm595_vm14, %v2718_v20, 0.0  ;;  %v2732_v1 = vld [vmem:[#allocation55_spill] sm:$0xff]  ;;  %v170_v20 = vld [vmem:[#allocation2 + $0x3e0] sm:$0xff] }
  0xd5   :  { %v759_v34 = vsel %vm631_vm15, %v2719_v57, 0.0  ;;  %vm606_vm4 = vcmp.eq.s32.totalorder %v1707_v50, %v2058_v13  ;;  %vm633_vm5 = vcmp.eq.s32.totalorder %v1727_v55, %v2033_v31  ;;  %vm607_vm6 = vcmp.eq.s32.totalorder %v1713_v30, %v2058_v13  ;;  %v2733_v48 = vld [vmem:[#allocation59_spill] sm:$0xff] }
  0xd6   :  { %887 = vadd.xlane.f32.xlu1 %v886_v44  ;;  %v857_v46 = vadd.f32 %v856_v45, %v722_v47  ;;  %v899_v51 = vadd.f32 %v898_v38, %v759_v34  ;;  %v724_v4 = vsel %vm596_vm1, %v2720_v59, 0.0  ;;  %v760_v41 = vsel %vm632_vm2, %v2721_v8, 0.0  ;;  %v2734_v38 = vld [vmem:[#allocation79_spill] sm:$0xff] }
  0xd7   :  { %v733_v53 = vsel %vm605_vm3, %v2722_v36, 0.0  ;;  %v734_v7 = vsel %vm606_vm4, %v2723_v43, 0.0  ;;  %vm634_vm7 = vcmp.eq.s32.totalorder %v1734_v0, %v2033_v31  ;;  %vm635_vm8 = vcmp.eq.s32.totalorder %v1737_v14, %v2033_v31  ;;  %v2735_v57 = vld [vmem:[#allocation63_spill] sm:$0xff] }
  0xd8   :  { %v858_v54 = vadd.f32 %v857_v46, %v723_v12  ;;  %v900_v25 = vadd.f32 %v899_v51, %v760_v41  ;;  %v761_v37 = vsel %vm633_vm5, %v2724_v5, 0.0  ;;  %vm608_vm9 = vcmp.eq.s32.totalorder %v1722_v40, %v2058_v13  ;;  %v2736_v51 = vld [vmem:[#allocation40_spill] sm:$0xff]  ;;  %v171_v41 = vld [vmem:[#allocation2 + $0x3e8] sm:$0xff] }
  0xd9   :  { %v735_v56 = vsel %vm607_vm6, %v2725_v27, 0.0  ;;  %v871_v62 = vadd.f32 %v734_v7, %v733_v53  ;;  %vm645_vm10 = vcmp.eq.s32.totalorder %v1698_v49, %v2092_v6  ;;  %vm646_vm11 = vcmp.eq.s32.totalorder %v1707_v50, %v2092_v6  ;;  %v1178_v53 = vld [vmem:[#allocation2 + $0x308] sm:$0xff]  ;;  %v164_v7 = vld [vmem:[#allocation2 + $0x3b0] sm:$0xff] }
  0xda   :  { %v859_v16 = vadd.f32 %v858_v54, %v724_v4  ;;  %v901_v58 = vadd.f32 %v900_v25, %v761_v37  ;;  %vm636_vm12 = vcmp.eq.s32.totalorder %v1746_v9, %v2033_v31  ;;  %v762_v52 = vsel %vm634_vm7, %v2726_v22, 0.0  ;;  %v2729_v31 = vld [vmem:[#allocation76_spill] sm:$0xff]  ;;  %v2155_v4 = vpop.permute.xlu0 %520  ;;  %v2737_v54 = vld [vmem:[#allocation67_spill] sm:$0xff] }
  0xdb   :  { %vm609_vm13 = vcmp.eq.s32.totalorder %v1727_v55, %v2058_v13  ;;  %v872_v15 = vadd.f32 %v871_v62, %v735_v56  ;;  %v763_v23 = vsel %vm635_vm8, %v2727_v39, 0.0  ;;  %vm610_vm14 = vcmp.eq.s32.totalorder %v1734_v0, %v2058_v13  ;;  %v172_v27 = vld [vmem:[#allocation2 + $0x3f0] sm:$0xff]  ;;  %v2739_v39 = vld [vmem:[#allocation56_spill] sm:$0xff] }
  0xdc   :  { %860 = vadd.xlane.f32.xlu0 %v859_v16  ;;  %v902_v11 = vadd.f32 %v901_v58, %v762_v52  ;;  %v736_v19 = vsel %vm608_vm9, %v2728_v60, 0.0  ;;  %vm647_vm15 = vcmp.eq.s32.totalorder %v1713_v30, %v2092_v6  ;;  %v773_v17 = vsel %vm645_vm10, %v2729_v31, 0.0  ;;  %v2738_v16 = vld [vmem:[#allocation50_spill] sm:$0xff] }
  0xdd   :  { %v873_v2 = vadd.f32 %v872_v15, %v736_v19  ;;  %v774_v63 = vsel %vm646_vm11, %v2730_v10, 0.0  ;;  %v764_v18 = vsel %vm636_vm12, %v2731_v28, 0.0  ;;  %vm611_vm1 = vcmp.eq.s32.totalorder %v1737_v14, %v2058_v13  ;;  %v2741_v60 = vld [vmem:[#allocation74_spill] sm:$0xff]  ;;  %v165_v28 = vld [vmem:[#allocation2 + $0x3b8] sm:$0xff] }
  0xde   :  { %v903_v32 = vadd.f32 %v902_v11, %v763_v23  ;;  %v737_v33 = vsel %vm609_vm13, %v2732_v1, 0.0  ;;  %v738_v35 = vsel %vm610_vm14, %v2733_v48, 0.0  ;;  %vm648_vm2 = vcmp.eq.s32.totalorder %v1722_v40, %v2092_v6 }
  0xdf   :  { %v874_v26 = vadd.f32 %v873_v2, %v737_v33  ;;  %v916_v44 = vadd.f32 %v774_v63, %v773_v17  ;;  %v775_v29 = vsel %vm647_vm15, %v2734_v38, 0.0  ;;  %vm621_vm3 = vcmp.eq.s32.totalorder %v1698_v49, %v2125_v24  ;;  %v2744_v33 = vld [vmem:[#allocation75_spill] sm:$0xff]  ;;  %v2746_v38 = vld [vmem:[#allocation78_spill] sm:$0xff] }
  0xe0   :  { %v904_v45 = vadd.f32 %v903_v32, %v764_v18  ;;  %vm622_vm4 = vcmp.eq.s32.totalorder %v1707_v50, %v2125_v24  ;;  %vm612_vm5 = vcmp.eq.s32.totalorder %v1746_v9, %v2058_v13  ;;  %vm649_vm6 = vcmp.eq.s32.totalorder %v1727_v55, %v2092_v6  ;;  %v2743_v32 = vld [vmem:[#allocation64_spill] sm:$0xff] }
  0xe1   :  { %v875_v47 = vadd.f32 %v874_v26, %v738_v35  ;;  %v917_v12 = vadd.f32 %v916_v44, %v775_v29  ;;  %v739_v34 = vsel %vm611_vm1, %v2735_v57, 0.0  ;;  %vm650_vm7 = vcmp.eq.s32.totalorder %v1734_v0, %v2092_v6  ;;  %v2748_v57 = vld [vmem:[#allocation80_spill] sm:$0xff] }
  0xe2   :  { %905 = vadd.xlane.f32.xlu1 %v904_v45  ;;  %v776_v46 = vsel %vm648_vm2, %v1766_v21, 0.0  ;;  %v749_v59 = vsel %vm621_vm3, %v2736_v51, 0.0  ;;  %vm623_vm8 = vcmp.eq.s32.totalorder %v1713_v30, %v2125_v24  ;;  %v750_v43 = vsel %vm622_vm4, %v1178_v53, 0.0  ;;  %v2745_v45 = vld [vmem:[#allocation68_spill] sm:$0xff] }
  0xe3   :  { %v876_v8 = vadd.f32 %v875_v47, %v739_v34  ;;  %v918_v36 = vadd.f32 %v917_v12, %v776_v46  ;;  %v740_v21 = vsel %vm612_vm5, %v2737_v54, 0.0  ;;  %vm651_vm9 = vcmp.eq.s32.totalorder %v1737_v14, %v2092_v6 }
  0xe4   :  { %v777_v25 = vsel %vm649_vm6, %v170_v20, 0.0  ;;  %v339_v5 = vadd.f32 %v1882_v42, %v164_v7  ;;  %vm624_vm10 = vcmp.eq.s32.totalorder %v1722_v40, %v2125_v24  ;;  %v889_v62 = vadd.f32 %v750_v43, %v749_v59  ;;  %v173_v42 = vld [vmem:[#allocation2 + $0x3f8] sm:$0xff] }
  0xe5   :  { %v877_v37 = vadd.f32 %v876_v8, %v740_v21  ;;  %v919_v56 = vadd.f32 %v918_v36, %v777_v25  ;;  %v778_v13 = vsel %vm650_vm7, %v171_v41, 0.0  ;;  %v751_v58 = vsel %vm623_vm8, %v2738_v16, 0.0  ;;  %v216_v21 = vpop.xlane.xlu0 %215 }
  0xe6   :  { %vm637_vm11 = vcmp.eq.s32.totalorder %v1698_v49, %v2155_v4  ;;  %vm638_vm12 = vcmp.eq.s32.totalorder %v1707_v50, %v2155_v4  ;;  %vm652_vm13 = vcmp.eq.s32.totalorder %v1746_v9, %v2092_v6  ;;  %vm625_vm14 = vcmp.eq.s32.totalorder %v1727_v55, %v2125_v24  ;;  %v2740_v49 = vld [vmem:[#allocation73_spill] sm:$0xff]  ;;  %v2742_v6 = vld [vmem:[#allocation60_spill] sm:$0xff] }
  0xe7   :  { %878 = vadd.xlane.f32.xlu0 %v877_v37  ;;  %v920_v22 = vadd.f32 %v919_v56, %v778_v13  ;;  %v890_v52 = vadd.f32 %v889_v62, %v751_v58  ;;  %v779_v15 = vsel %vm651_vm9, %v172_v27, 0.0  ;;  %v752_v23 = vsel %vm624_vm10, %v2739_v39, 0.0  ;;  %v386_v62 = vld [vmem:[#allocation2] sm:$0xff] }
  0xe8   :  { %v765_v11 = vsel %vm637_vm11, %v2740_v49, 0.0  ;;  %v766_v50 = vsel %vm638_vm12, %v2741_v60, 0.0  ;;  %vm626_vm15 = vcmp.eq.s32.totalorder %v1734_v0, %v2125_v24  ;;  %vm639_vm1 = vcmp.eq.s32.totalorder %v1713_v30, %v2155_v4 }
  0xe9   :  { %v921_v19 = vadd.f32 %v920_v22, %v779_v15  ;;  %v891_v2 = vadd.f32 %v890_v52, %v752_v23  ;;  %v780_v31 = vsel %vm652_vm13, %v173_v42, 0.0  ;;  %vm627_vm2 = vcmp.eq.s32.totalorder %v1737_v14, %v2125_v24  ;;  %v225_v25 = vpop.xlane.xlu0 %224  ;;  %v1179_v22 = vld [vmem:[%s2519_s1] sm:$0xff] }
  0xea   :  { %v753_v17 = vsel %vm625_vm14, %v2742_v6, 0.0  ;;  %vm640_vm3 = vcmp.eq.s32.totalorder %v1722_v40, %v2155_v4  ;;  %v907_v18 = vadd.f32 %v766_v50, %v765_v11  ;;  %v754_v1 = vsel %vm626_vm15, %v2743_v32, 0.0  ;;  %v387_v15 = vld [vmem:[#allocation2 + $0x40] sm:$0xff] }
  0xeb   :  { %v922_v10 = vadd.f32 %v921_v19, %v780_v31  ;;  %v892_v63 = vadd.f32 %v891_v2, %v753_v17  ;;  %v767_v48 = vsel %vm639_vm1, %v2744_v33, 0.0  ;;  %v340_v35 = vadd.f32 %v339_v5, %v165_v28  ;;  %v1180_v31 = vld [vmem:[%s2519_s1 + $0x18] sm:$0xff] }
  0xec   :  { %v346_v30 = vadd.f32 %v1776_v3, %v170_v20  ;;  %vm628_vm4 = vcmp.eq.s32.totalorder %v1746_v9, %v2125_v24  ;;  %vm641_vm5 = vcmp.eq.s32.totalorder %v1727_v55, %v2155_v4  ;;  %v908_v44 = vadd.f32 %v907_v18, %v767_v48  ;;  %v2747_v20 = vld [vmem:[#allocation71_spill] sm:$0xff] }
  0xed   :  { %923 = vadd.xlane.f32.xlu1 %v922_v10  ;;  %v893_v26 = vadd.f32 %v892_v63, %v754_v1  ;;  %v755_v40 = vsel %vm627_vm2, %v2745_v45, 0.0  ;;  %v768_v29 = vsel %vm640_vm3, %v2746_v38, 0.0  ;;  %vm642_vm6 = vcmp.eq.s32.totalorder %v1734_v0, %v2155_v4  ;;  %v1117_v45 = vld [vmem:[%s2520_s2] sm:$0xff] }
  0xee   :  { %v909_v3 = vadd.f32 %v908_v44, %v768_v29  ;;  %v756_v12 = vsel %vm628_vm4, %v2747_v20, 0.0  ;;  %v769_v34 = vsel %vm641_vm5, %v2748_v57, 0.0  ;;  %vm643_vm7 = vcmp.eq.s32.totalorder %v1737_v14, %v2155_v4  ;;  %v2222_v14 = vpop.xlane.xlu1 %233  ;;  %v391_v38 = vld [vmem:[#allocation2 + $0x140] sm:$0xff]  ;;  %v1181_v20 = vld [vmem:[%s2519_s1 + $0x8] sm:$0xff] }
  0xef   :  { %v894_v47 = vadd.f32 %v893_v26, %v755_v40  ;;  %v347_v51 = vadd.f32 %v346_v30, %v171_v41  ;;  %v770_v24 = vsel %vm642_vm6, %v1875_v61, 0.0  ;;  %vm644_vm8 = vcmp.eq.s32.totalorder %v1746_v9, %v2155_v4  ;;  %v243_v61 = vpop.xlane.xlu0 %242 }
  0xf0   :  { %v910_v55 = vadd.f32 %v909_v3, %v769_v34  ;;  %v771_v0 = vsel %vm643_vm7, %v164_v7, 0.0  ;;  %v772_v53 = vsel %vm644_vm8, %v165_v28, 0.0  ;;  %v403_v13 = vmul.f32 0.0001002004, %v386_v62 }
  0xf1   :  { %v895_v46 = vadd.f32 %v894_v47, %v756_v12  ;;  %341 = vadd.xlane.f32.xlu1 %v340_v35  ;;  %v348_v36 = vadd.f32 %v347_v51, %v172_v27  ;;  %v353_v16 = vmul.f32 0.0001002004, %v216_v21  ;;  %vm925_vm9 = vcmp.ge.s32.totalorder %v1179_v22, 0 }
  0xf2   :  { %v911_v59 = vadd.f32 %v910_v55, %v770_v24  ;;  %v2224_v41 = vpop.xlane.xlu1 %251  ;;  %vm941_vm10 = vcmp.lt.s32.totalorder %v1179_v22, 1024  ;;  %vm1037_vm11 = vcmp.eq.s32.totalorder %v1179_v22, 0  ;;  %v419_v49 = vsub.f32 -0.0009226792, %v403_v13 }
  0xf3   :  { %896 = vadd.xlane.f32.xlu0 %v895_v46  ;;  %v349_v54 = vadd.f32 %v348_v36, %v173_v42  ;;  %v2228_v37 = vpop.xlane.xlu0 %260  ;;  %v389_v42 = vld [vmem:[#allocation2 + $0xc0] sm:$0xff]  ;;  %v370_v11 = vsub.f32 -0.9226792, %v353_v16  ;;  %v356_v50 = vmul.f32 0.0001002004, %v243_v61  ;;  %vm928_vm12 = vcmp.ge.s32.totalorder %v1180_v31, 0  ;;  %vm2252_vm14 = vmand %vm925_vm9, %vm941_vm10 }
  0xf4   :  { %v912_v8 = vadd.f32 %v911_v59, %v771_v0  ;;  %v406_v60 = vmul.f32 0.0001002004, %v389_v42  ;;  %vm944_vm13 = vcmp.lt.s32.totalorder %v1180_v31, 1024  ;;  %v404_v32 = vmul.f32 0.0001002004, %v387_v15  ;;  %v388_v59 = vld [vmem:[#allocation2 + $0x80] sm:$0xff] }
  0xf5   :  { %vm1040_vm15 = vcmp.eq.s32.totalorder %v1180_v31, 0  ;;  %v452_v48 = vsub.f32 %v370_v11, %v419_v49  ;;  %v373_v35 = vsub.f32 -0.9226792, %v356_v50  ;;  %v354_v40 = vmul.f32 0.0001002004, %v225_v25  ;;  %vm2264_vm1 = vmand %vm928_vm12, %vm944_vm13  ;;  %v1120_v36 = vld [vmem:[%s2520_s2 + $0x18] sm:$0xff] }
  0xf6   :  { %v913_v43 = vadd.f32 %v912_v8, %v772_v53  ;;  %v2226_v5 = vpop.xlane.xlu1 %269  ;;  %v422_v1 = vsub.f32 -0.0009226792, %v406_v60  ;;  %vm926_vm2 = vcmp.ge.s32.totalorder %v1181_v20, 0  ;;  %vm942_vm3 = vcmp.lt.s32.totalorder %v1181_v20, 1024  ;;  %v1182_v16 = vld [vmem:[%s2519_s1 + $0x28] sm:$0xff] }
  0xf7   :  { %v2232_v4 = vpop.xlane.xlu0 %278  ;;  %v420_v12 = vsub.f32 -0.0009226792, %v404_v32  ;;  %v408_v0 = vmul.f32 0.0001002004, %v391_v38  ;;  %vm1038_vm4 = vcmp.eq.s32.totalorder %v1181_v20, 0  ;;  %vm2283_vm5 = vmand %vm926_vm2, %vm942_vm3  ;;  %vm930_vm6 = vcmp.ge.s32.totalorder %v1182_v16, 0 }
  0xf8   :  { %914 = vadd.xlane.f32.xlu0 %v913_v43  ;;  %v455_v46 = vsub.f32 %v373_v35, %v422_v1  ;;  %v371_v53 = vsub.f32 -0.9226792, %v354_v40  ;;  %v358_v25 = vmul.f32 0.0001002004, %v2228_v37  ;;  %v405_v42 = vmul.f32 0.0001002004, %v388_v59 }
  0xf9   :  { %vm946_vm7 = vcmp.lt.s32.totalorder %v1182_v16, 1024  ;;  %v355_v49 = vmul.f32 0.0001002004, %v2222_v14  ;;  %v1118_v60 = vld [vmem:[%s2520_s2 + $0x8] sm:$0xff]  ;;  %vm1042_vm8 = vcmp.eq.s32.totalorder %v1182_v16, 0  ;;  %v390_v38 = vld [vmem:[#allocation2 + $0x100] sm:$0xff] }
  0xfa   :  { %v2230_v9 = vpop.xlane.xlu1 %287  ;;  %v453_v15 = vsub.f32 %v371_v53, %v420_v12  ;;  %v375_v50 = vsub.f32 -0.9226792, %v358_v25  ;;  %vm2304_vm10 = vmand %vm930_vm6, %vm946_vm7  ;;  %v357_v25 = vmul.f32 0.0001002004, %v2224_v41 }
  0xfb   :  { %v2236_v27 = vpop.xlane.xlu0 %296  ;;  %v372_v35 = vsub.f32 -0.9226792, %v355_v49 }
  0xfc   :  { %350 = vadd.xlane.f32.xlu0 %v349_v54 }
  0xfe   :  { %v2234_v7 = vpop.xlane.xlu1 %305 }
  0xff   :  { %v2240_v58 = vpop.xlane.xlu0 %314 }
 0x102   :  { %v2238_v56 = vpop.xlane.xlu1 %323 }
 0x103   :  { %v2248_v6 = vpop.xlane.xlu0 %332 }
 0x131   :  { %v789_v52 = vpop.xlane.xlu1 %788 }
 0x132   :  { %v973_v39 = vmul.f32 0.9, %v789_v52  ;;  %v1005_v23 = vmul.f32 0.0001002004, %v789_v52 }
 0x134   :  { %v989_v19 = vsub.f32 -0.09482446, %v973_v39  ;;  %v1021_v2 = vsub.f32 -0.0009226792, %v1005_v23  ;;  %v424_v39 = vsub.f32 -0.0009226792, %v408_v0 }
 0x135   :  { %v816_v17 = vpop.xlane.xlu1 %815 }
 0x136   :  { %v1053_v63 = vsel %vm1037_vm11, 0.0, %v1021_v2  ;;  %v976_v28 = vmul.f32 0.9, %v816_v17  ;;  %v1008_v18 = vmul.f32 0.0001002004, %v816_v17  ;;  %v1183_v17 = vld [vmem:[%s2519_s1 + $0x10] sm:$0xff] }
 0x137   :  { %v1069_v33 = vsub.f32 %v989_v19, %v1053_v63  ;;  %vm927_vm9 = vcmp.ge.s32.totalorder %v1183_v17, 0  ;;  %vm943_vm11 = vcmp.lt.s32.totalorder %v1183_v17, 1024  ;;  %vm1039_vm12 = vcmp.eq.s32.totalorder %v1183_v17, 0 }
 0x138   :  { %v992_v30 = vsub.f32 -0.09482446, %v976_v28  ;;  %v1024_v26 = vsub.f32 -0.0009226792, %v1008_v18  ;;  %v393_v18 = vld [vmem:[#allocation2 + $0x1c0] sm:$0xff]  ;;  %vm2320_vm13 = vmand %vm927_vm9, %vm943_vm11 }
 0x139   :  { %v1085_v44 = vsel %vm2252_vm14, %v1069_v33, 0.0  ;;  %v362_v17 = vmul.f32 0.0001002004, %v2236_v27 }
 0x13a   :  { %v1101_v29 = vadd.f32 %v1085_v44, %v452_v48  ;;  %v1056_v3 = vsel %vm1040_vm15, 0.0, %v1024_v26  ;;  %v421_v48 = vsub.f32 -0.0009226792, %v405_v42  ;;  %v1122_v44 = vld [vmem:[%s2520_s2 + $0x28] sm:$0xff]  ;;  %v1185_v42 = vld [vmem:[%s2519_s1 + $0x20] sm:$0xff] }
 0x13b   :  { %v1072_v57 = vsub.f32 %v992_v30, %v1056_v3  ;;  %v798_v34 = vpop.xlane.xlu0 %797  ;;  %v457_v30 = vsub.f32 %v375_v50, %v424_v39  ;;  %v360_v3 = vmul.f32 0.0001002004, %v2232_v4  ;;  %vm929_vm3 = vcmp.ge.s32.totalorder %v1185_v42, 0 }
 0x13c   :  { %v1133_v55 = vadd.f32 %v1117_v45, %v1101_v29  ;;  %v974_v51 = vmul.f32 0.9, %v798_v34  ;;  %v1006_v24 = vmul.f32 0.0001002004, %v798_v34  ;;  %v410_v29 = vmul.f32 0.0001002004, %v393_v18 }
 0x13d   :  { %v1088_v8 = vsel %vm2264_vm1, %v1072_v57, 0.0  ;;  %v1184_v57 = vld [vmem:[%s2519_s1 + $0x38] sm:$0xff]  ;;  %v377_v53 = vsub.f32 -0.9226792, %v360_v3  ;;  %v374_v50 = vsub.f32 -0.9226792, %v357_v25 }
 0x13e   :  { %1150 = vst.msk [vmem:[%s2520_s2] sm:$0xff] %vm29_vm0, %v1133_v55  ;;  %v1104_v43 = vadd.f32 %v1088_v8, %v455_v46  ;;  %v990_v54 = vsub.f32 -0.09482446, %v974_v51  ;;  %v1022_v21 = vsub.f32 -0.0009226792, %v1006_v24  ;;  %vm932_vm14 = vcmp.ge.s32.totalorder %v1184_v57, 0 }
 0x13f   :  { %v454_v51 = vsub.f32 %v372_v35, %v421_v48  ;;  %v407_v24 = vmul.f32 0.0001002004, %v390_v38  ;;  %vm948_vm15 = vcmp.lt.s32.totalorder %v1184_v57, 1024  ;;  %v426_v4 = vsub.f32 -0.0009226792, %v410_v29 }
 0x140   :  { %v1136_v61 = vadd.f32 %v1120_v36, %v1104_v43  ;;  %v1054_v13 = vsel %vm1038_vm4, 0.0, %v1022_v21  ;;  %v834_v52 = vpop.xlane.xlu1 %833  ;;  %v1119_v36 = vld [vmem:[%s2520_s2 + $0x10] sm:$0xff]  ;;  %vm1044_vm1 = vcmp.eq.s32.totalorder %v1184_v57, 0  ;;  %vm2338_vm2 = vmand %vm932_vm14, %vm948_vm15  ;;  %vm945_vm4 = vcmp.lt.s32.totalorder %v1185_v42, 1024  ;;  %v397_v57 = vld [vmem:[#allocation2 + $0x2c0] sm:$0xff] }
 0x141   :  { %v1070_v22 = vsub.f32 %v990_v54, %v1054_v13  ;;  %v978_v37 = vmul.f32 0.9, %v834_v52  ;;  %v1010_v23 = vmul.f32 0.0001002004, %v834_v52  ;;  %v459_v39 = vsub.f32 %v377_v53, %v426_v4  ;;  %vm2357_vm6 = vmand %vm929_vm3, %vm945_vm4  ;;  %v1126_v4 = vld [vmem:[%s2520_s2 + $0x48] sm:$0xff] }
 0x142   :  { %1153 = vst.msk [vmem:[%s2520_s2 + $0x18] sm:$0xff] %vm29_vm0, %v1136_v61  ;;  %v395_v61 = vld [vmem:[#allocation2 + $0x240] sm:$0xff]  ;;  %v414_v53 = vmul.f32 0.0001002004, %v397_v57  ;;  %v363_v57 = vmul.f32 0.0001002004, %v2234_v7 }
 0x143   :  { %v1086_v11 = vsel %vm2283_vm5, %v1070_v22, 0.0  ;;  %v994_v2 = vsub.f32 -0.09482446, %v978_v37  ;;  %v1026_v31 = vsub.f32 -0.0009226792, %v1010_v23  ;;  %v392_v23 = vld [vmem:[#allocation2 + $0x180] sm:$0xff] }
 0x144   :  { %v1102_v19 = vadd.f32 %v1086_v11, %v453_v15  ;;  %v423_v15 = vsub.f32 -0.0009226792, %v407_v24  ;;  %v412_v49 = vmul.f32 0.0001002004, %v395_v61  ;;  %vm1041_vm5 = vcmp.eq.s32.totalorder %v1185_v42, 0 }
 0x145   :  { %v1058_v63 = vsel %vm1042_vm8, 0.0, %v1026_v31  ;;  %v409_v18 = vmul.f32 0.0001002004, %v392_v23 }
 0x146   :  { %v1134_v10 = vadd.f32 %v1118_v60, %v1102_v19  ;;  %v807_v28 = vpop.xlane.xlu0 %806  ;;  %v1074_v32 = vsub.f32 %v994_v2, %v1058_v63  ;;  %v1124_v60 = vld [vmem:[%s2520_s2 + $0x38] sm:$0xff]  ;;  %v428_v48 = vsub.f32 -0.0009226792, %v412_v49 }
 0x147   :  { %v975_v1 = vmul.f32 0.9, %v807_v28  ;;  %v1007_v33 = vmul.f32 0.0001002004, %v807_v28  ;;  %v1186_v28 = vld [vmem:[%s2519_s1 + $0x48] sm:$0xff] }
 0x148   :  { %1151 = vst.msk [vmem:[%s2520_s2 + $0x8] sm:$0xff] %vm29_vm0, %v1134_v10  ;;  %v1090_v26 = vsel %vm2304_vm10, %v1074_v32, 0.0  ;;  %vm934_vm7 = vcmp.ge.s32.totalorder %v1186_v28, 0  ;;  %vm950_vm8 = vcmp.lt.s32.totalorder %v1186_v28, 1024  ;;  %vm1046_vm9 = vcmp.eq.s32.totalorder %v1186_v28, 0  ;;  %v399_v28 = vld [vmem:[#allocation2 + $0x340] sm:$0xff] }
 0x149   :  { %v991_v45 = vsub.f32 -0.09482446, %v975_v1  ;;  %v1023_v40 = vsub.f32 -0.0009226792, %v1007_v33  ;;  %v1106_v47 = vadd.f32 %v1090_v26, %v457_v30  ;;  %v456_v33 = vsub.f32 %v374_v50, %v423_v15  ;;  %vm2378_vm11 = vmand %vm934_vm7, %vm950_vm8 }
 0x14a   :  { %v359_v30 = vmul.f32 0.0001002004, %v2226_v5  ;;  %v361_v50 = vmul.f32 0.0001002004, %v2230_v9 }
 0x14b   :  { %v1055_v12 = vsel %vm1039_vm12, 0.0, %v1023_v40  ;;  %v1138_v34 = vadd.f32 %v1122_v44, %v1106_v47  ;;  %v1121_v44 = vld [vmem:[%s2520_s2 + $0x20] sm:$0xff]  ;;  %v1187_v47 = vld [vmem:[%s2519_s1 + $0x30] sm:$0xff] }
 0x14c   :  { %v1071_v46 = vsub.f32 %v991_v45, %v1055_v12  ;;  %v852_v55 = vpop.xlane.xlu1 %851  ;;  %v379_v45 = vsub.f32 -0.9226792, %v362_v17  ;;  %vm931_vm10 = vcmp.ge.s32.totalorder %v1187_v47, 0  ;;  %vm947_vm12 = vcmp.lt.s32.totalorder %v1187_v47, 1024  ;;  %v1189_v17 = vld [vmem:[%s2519_s1 + $0x40] sm:$0xff] }
 0x14d   :  { %v980_v59 = vmul.f32 0.9, %v852_v55  ;;  %v1012_v0 = vmul.f32 0.0001002004, %v852_v55  ;;  %1155 = vst.msk [vmem:[%s2520_s2 + $0x28] sm:$0xff] %vm29_vm0, %v1138_v34  ;;  %vm2394_vm14 = vmand %vm931_vm10, %vm947_vm12  ;;  %vm933_vm4 = vcmp.ge.s32.totalorder %v1189_v17, 0 }
 0x14e   :  { %v1087_v8 = vsel %vm2320_vm13, %v1071_v46, 0.0  ;;  %v376_v24 = vsub.f32 -0.9226792, %v359_v30  ;;  %vm1043_vm13 = vcmp.eq.s32.totalorder %v1187_v47, 0  ;;  %v1190_v47 = vld [vmem:[%s2519_s1 + $0x68] sm:$0xff] }
 0x14f   :  { %v1103_v43 = vadd.f32 %v1087_v8, %v454_v51  ;;  %v996_v54 = vsub.f32 -0.09482446, %v980_v59  ;;  %v1028_v21 = vsub.f32 -0.0009226792, %v1012_v0  ;;  %v425_v51 = vsub.f32 -0.0009226792, %v409_v18 }
 0x150   :  { %v461_v59 = vsub.f32 %v379_v45, %v428_v48  ;;  %v1128_v48 = vld [vmem:[%s2520_s2 + $0x58] sm:$0xff]  ;;  %v366_v45 = vmul.f32 0.0001002004, %v2248_v6  ;;  %vm938_vm8 = vcmp.ge.s32.totalorder %v1190_v47, 0  ;;  %vm1050_vm10 = vcmp.eq.s32.totalorder %v1190_v47, 0 }
 0x151   :  { %v1135_v62 = vadd.f32 %v1119_v36, %v1103_v43  ;;  %v1060_v16 = vsel %vm1044_vm1, 0.0, %v1028_v21  ;;  %v458_v42 = vsub.f32 %v376_v24, %v425_v51  ;;  %v1125_v51 = vld [vmem:[%s2520_s2 + $0x40] sm:$0xff] }
 0x152   :  { %v1076_v22 = vsub.f32 %v996_v54, %v1060_v16  ;;  %v825_v52 = vpop.xlane.xlu0 %824  ;;  %v364_v54 = vmul.f32 0.0001002004, %v2240_v58  ;;  %v1188_v16 = vld [vmem:[%s2519_s1 + $0x58] sm:$0xff]  ;;  %v430_v58 = vsub.f32 -0.0009226792, %v414_v53 }
 0x153   :  { %1152 = vst.msk [vmem:[%s2520_s2 + $0x10] sm:$0xff] %vm29_vm0, %v1135_v62  ;;  %v977_v41 = vmul.f32 0.9, %v825_v52  ;;  %v1009_v37 = vmul.f32 0.0001002004, %v825_v52  ;;  %vm936_vm15 = vcmp.ge.s32.totalorder %v1188_v16, 0 }
 0x154   :  { %v1092_v11 = vsel %vm2338_vm2, %v1076_v22, 0.0  ;;  %v394_v22 = vld [vmem:[#allocation2 + $0x200] sm:$0xff]  ;;  %vm952_vm1 = vcmp.lt.s32.totalorder %v1188_v16, 1024  ;;  %vm1048_vm2 = vcmp.eq.s32.totalorder %v1188_v16, 0  ;;  %v383_v24 = vsub.f32 -0.9226792, %v366_v45 }
 0x155   :  { %v1108_v19 = vadd.f32 %v1092_v11, %v459_v39  ;;  %v993_v2 = vsub.f32 -0.09482446, %v977_v41  ;;  %v1025_v31 = vsub.f32 -0.0009226792, %v1009_v37  ;;  %v1123_v41 = vld [vmem:[%s2520_s2 + $0x30] sm:$0xff]  ;;  %vm2412_vm3 = vmand %vm936_vm15, %vm952_vm1 }
 0x156   :  { %v381_v37 = vsub.f32 -0.9226792, %v364_v54 }
 0x157   :  { %v1140_v10 = vadd.f32 %v1124_v60, %v1108_v19  ;;  %v1057_v63 = vsel %vm1041_vm5, 0.0, %v1025_v31  ;;  %v411_v60 = vmul.f32 0.0001002004, %v394_v22  ;;  %vm949_vm5 = vcmp.lt.s32.totalorder %v1189_v17, 1024 }
 0x158   :  { %v1073_v32 = vsub.f32 %v993_v2, %v1057_v63  ;;  %v870_v1 = vpop.xlane.xlu1 %869  ;;  %v463_v63 = vsub.f32 %v381_v37, %v430_v58  ;;  %vm2431_vm7 = vmand %vm933_vm4, %vm949_vm5  ;;  %v398_v58 = vld [vmem:[#allocation2 + $0x300] sm:$0xff]  ;;  %v365_v2 = vmul.f32 0.0001002004, %v2238_v56 }
 0x159   :  { %1157 = vst.msk [vmem:[%s2520_s2 + $0x38] sm:$0xff] %vm29_vm0, %v1140_v10  ;;  %v982_v27 = vmul.f32 0.9, %v870_v1  ;;  %v1014_v35 = vmul.f32 0.0001002004, %v870_v1  ;;  %v396_v1 = vld [vmem:[#allocation2 + $0x280] sm:$0xff] }
 0x15a   :  { %v1089_v26 = vsel %vm2357_vm6, %v1073_v32, 0.0  ;;  %v427_v32 = vsub.f32 -0.0009226792, %v411_v60  ;;  %vm1045_vm6 = vcmp.eq.s32.totalorder %v1189_v17, 0  ;;  %v1127_v60 = vld [vmem:[%s2520_s2 + $0x50] sm:$0xff]  ;;  %v1192_v17 = vld [vmem:[%s2519_s1 + $0x60] sm:$0xff] }
 0x15b   :  { %v1105_v40 = vadd.f32 %v1089_v26, %v456_v33  ;;  %v998_v38 = vsub.f32 -0.09482446, %v982_v27  ;;  %v1030_v29 = vsub.f32 -0.0009226792, %v1014_v35  ;;  %v378_v27 = vsub.f32 -0.9226792, %v361_v50 }
 0x15c   :  { %vm937_vm1 = vcmp.ge.s32.totalorder %v1192_v17, 0  ;;  %v1193_v56 = vld [vmem:[#allocation2 + $0x380] sm:$0xff] }
 0x15d   :  { %v1137_v3 = vadd.f32 %v1121_v44, %v1105_v40  ;;  %v1062_v20 = vsel %vm1046_vm9, 0.0, %v1030_v29  ;;  %v843_v12 = vpop.xlane.xlu0 %842  ;;  %v416_v44 = vmul.f32 0.0001002004, %v399_v28  ;;  %vm954_vm9 = vcmp.lt.s32.totalorder %v1190_v47, 1024 }
 0x15e   :  { %v1078_v34 = vsub.f32 %v998_v38, %v1062_v20  ;;  %v979_v46 = vmul.f32 0.9, %v843_v12  ;;  %v1011_v55 = vmul.f32 0.0001002004, %v843_v12  ;;  %v460_v12 = vsub.f32 %v378_v27, %v427_v32  ;;  %vm2452_vm12 = vmand %vm938_vm8, %vm954_vm9  ;;  %v1195_v38 = vld [vmem:[%s2519_s1 + $0x70] sm:$0xff] }
 0x15f   :  { %1154 = vst.msk [vmem:[%s2520_s2 + $0x20] sm:$0xff] %vm29_vm0, %v1137_v3  ;;  %v413_v3 = vmul.f32 0.0001002004, %v396_v1  ;;  %v382_v32 = vsub.f32 -0.9226792, %v365_v2  ;;  %vm955_vm8 = vcmp.lt.s32.totalorder %v1195_v38, 1024 }
 0x160   :  { %v1094_v0 = vsel %vm2378_vm11, %v1078_v34, 0.0  ;;  %v995_v8 = vsub.f32 -0.09482446, %v979_v46  ;;  %v1027_v36 = vsub.f32 -0.0009226792, %v1011_v55 }
 0x161   :  { %v1110_v43 = vadd.f32 %v1094_v0, %v461_v59  ;;  %v432_v46 = vsub.f32 -0.0009226792, %v416_v44  ;;  %v417_v1 = vmul.f32 0.0001002004, %v1193_v56 }
 0x162   :  { %v1059_v25 = vsel %vm1043_vm13, 0.0, %v1027_v36 }
 0x163   :  { %v1142_v61 = vadd.f32 %v1126_v4, %v1110_v43  ;;  %v1075_v62 = vsub.f32 %v995_v8, %v1059_v25  ;;  %v888_v13 = vpop.xlane.xlu1 %887  ;;  %v1191_v4 = vld [vmem:[%s2519_s1 + $0x50] sm:$0xff]  ;;  %v433_v47 = vsub.f32 -0.0009226792, %v417_v1 }
 0x164   :  { %v984_v52 = vmul.f32 0.9, %v888_v13  ;;  %v1016_v15 = vmul.f32 0.0001002004, %v888_v13  ;;  %vm935_vm11 = vcmp.ge.s32.totalorder %v1191_v4, 0  ;;  %vm951_vm13 = vcmp.lt.s32.totalorder %v1191_v4, 1024 }
 0x165   :  { %1159 = vst.msk [vmem:[%s2520_s2 + $0x48] sm:$0xff] %vm29_vm0, %v1142_v61  ;;  %v1091_v39 = vsel %vm2394_vm14, %v1075_v62, 0.0  ;;  %v429_v61 = vsub.f32 -0.0009226792, %v413_v3  ;;  %v380_v62 = vsub.f32 -0.9226792, %v363_v57  ;;  %v465_v13 = vsub.f32 %v383_v24, %v432_v46  ;;  %vm967_vm15 = vmand %vm935_vm11, %vm951_vm13 }
 0x166   :  { %v1107_v23 = vadd.f32 %v1091_v39, %v458_v42  ;;  %v1000_v49 = vsub.f32 -0.09482446, %v984_v52  ;;  %v1032_v11 = vsub.f32 -0.0009226792, %v1016_v15  ;;  %vm1047_vm14 = vcmp.eq.s32.totalorder %v1191_v4, 0  ;;  %v1130_v42 = vld [vmem:[%s2520_s2 + $0x68] sm:$0xff] }
 0x167   :  { %v1196_v3 = vld [vmem:[#allocation2 + $0x3c0] sm:$0xff] }
 0x168   :  { %v1139_v19 = vadd.f32 %v1123_v41, %v1107_v23  ;;  %v1064_v31 = vsel %vm1048_vm2, 0.0, %v1032_v11  ;;  %v462_v23 = vsub.f32 %v380_v62, %v429_v61  ;;  %vm953_vm2 = vcmp.lt.s32.totalorder %v1192_v17, 1024  ;;  %v1131_v62 = vld [vmem:[%s2520_s2 + $0x70] sm:$0xff] }
 0x169   :  { %v1080_v10 = vsub.f32 %v1000_v49, %v1064_v31  ;;  %v861_v14 = vpop.xlane.xlu0 %860  ;;  %v415_v49 = vmul.f32 0.0001002004, %v398_v58  ;;  %vm2486_vm5 = vmand %vm937_vm1, %vm953_vm2 }
 0x16a   :  { %1156 = vst.msk [vmem:[%s2520_s2 + $0x30] sm:$0xff] %vm29_vm0, %v1139_v19  ;;  %v981_v9 = vmul.f32 0.9, %v861_v14  ;;  %v1013_v18 = vmul.f32 0.0001002004, %v861_v14 }
 0x16b   :  { %v1096_v33 = vsel %vm2412_vm3, %v1080_v10, 0.0  ;;  %v431_v10 = vsub.f32 -0.0009226792, %v415_v49  ;;  %vm1049_vm3 = vcmp.eq.s32.totalorder %v1192_v17, 0 }
 0x16c   :  { %v1112_v35 = vadd.f32 %v1096_v33, %v463_v63  ;;  %v997_v30 = vsub.f32 -0.09482446, %v981_v9  ;;  %v1029_v26 = vsub.f32 -0.0009226792, %v1013_v18 }
 0x16e   :  { %v1144_v40 = vadd.f32 %v1128_v48, %v1112_v35  ;;  %v1061_v29 = vsel %vm1045_vm6, 0.0, %v1029_v26  ;;  %vm1051_vm6 = vcmp.eq.s32.totalorder %v1195_v38, 0 }
 0x16f   :  { %v1077_v5 = vsub.f32 %v997_v30, %v1061_v29  ;;  %v906_v20 = vpop.xlane.xlu1 %905  ;;  %v1194_v30 = vld [vmem:[%s2519_s1 + $0x78] sm:$0xff] }
 0x170   :  { %1161 = vst.msk [vmem:[%s2520_s2 + $0x58] sm:$0xff] %vm29_vm0, %v1144_v40  ;;  %v986_v6 = vmul.f32 0.9, %v906_v20  ;;  %v1018_v34 = vmul.f32 0.0001002004, %v906_v20  ;;  %vm1052_vm4 = vcmp.eq.s32.totalorder %v1194_v30, 0  ;;  %v464_v20 = vsub.f32 %v382_v32, %v431_v10 }
 0x171   :  { %v1093_v55 = vsel %vm2431_vm7, %v1077_v5, 0.0  ;;  %v418_v5 = vmul.f32 0.0001002004, %v1196_v3  ;;  %vm939_vm7 = vcmp.ge.s32.totalorder %v1195_v38, 0  ;;  %vm940_vm9 = vcmp.ge.s32.totalorder %v1194_v30, 0 }
 0x172   :  { %v1109_v59 = vadd.f32 %v1093_v55, %v460_v12  ;;  %v1002_v7 = vsub.f32 -0.09482446, %v986_v6  ;;  %v1034_v0 = vsub.f32 -0.0009226792, %v1018_v34  ;;  %v1129_v55 = vld [vmem:[%s2520_s2 + $0x60] sm:$0xff]  ;;  %vm971_vm11 = vmand %vm939_vm7, %vm955_vm8 }
 0x174   :  { %v1141_v8 = vadd.f32 %v1125_v51, %v1109_v59  ;;  %v1066_v53 = vsel %vm1050_vm10, 0.0, %v1034_v0  ;;  %v879_v43 = vpop.xlane.xlu0 %878  ;;  %v434_v0 = vsub.f32 -0.0009226792, %v418_v5  ;;  %vm956_vm10 = vcmp.lt.s32.totalorder %v1194_v30, 1024 }
 0x175   :  { %v1082_v54 = vsub.f32 %v1002_v7, %v1066_v53  ;;  %v983_v21 = vmul.f32 0.9, %v879_v43  ;;  %v1015_v25 = vmul.f32 0.0001002004, %v879_v43 }
 0x176   :  { %1158 = vst.msk [vmem:[%s2520_s2 + $0x40] sm:$0xff] %vm29_vm0, %v1141_v8 }
 0x177   :  { %v1098_v16 = vsel %vm2452_vm12, %v1082_v54, 0.0  ;;  %v999_v22 = vsub.f32 -0.09482446, %v983_v21  ;;  %v1031_v52 = vsub.f32 -0.0009226792, %v1015_v25  ;;  %vm972_vm12 = vmand %vm940_vm9, %vm956_vm10 }
 0x178   :  { %v1114_v15 = vadd.f32 %v1098_v16, %v465_v13 }
 0x179   :  { %v1063_v39 = vsel %vm1047_vm14, 0.0, %v1031_v52 }
 0x17a   :  { %v1146_v41 = vadd.f32 %v1130_v42, %v1114_v15  ;;  %v1079_v37 = vsub.f32 %v999_v22, %v1063_v39  ;;  %v924_v50 = vpop.xlane.xlu1 %923  ;;  %v1132_v22 = vld [vmem:[%s2520_s2 + $0x78] sm:$0xff] }
 0x17b   :  { %v1020_v28 = vmul.f32 0.0001002004, %v924_v50  ;;  %v988_v35 = vmul.f32 0.9, %v924_v50 }
 0x17c   :  { %1163 = vst.msk [vmem:[%s2520_s2 + $0x68] sm:$0xff] %vm29_vm0, %v1146_v41  ;;  %v1095_v11 = vsel %vm967_vm15, %v1079_v37, 0.0 }
 0x17d   :  { %v1111_v19 = vadd.f32 %v1095_v11, %v462_v23  ;;  %v1036_v26 = vsub.f32 -0.0009226792, %v1020_v28  ;;  %v1004_v34 = vsub.f32 -0.09482446, %v988_v35 }
 0x17e   :  { %v342_v63 = vpop.xlane.xlu1 %341 }
 0x17f   :  { %v1143_v31 = vadd.f32 %v1127_v60, %v1111_v19  ;;  %v367_v27 = vmul.f32 0.0001002004, %v342_v63  ;;  %v1068_v51 = vsel %vm1052_vm4, 0.0, %v1036_v26 }
 0x180   :  { %v897_v14 = vpop.xlane.xlu0 %896  ;;  %v1084_v54 = vsub.f32 %v1004_v34, %v1068_v51 }
 0x181   :  { %1160 = vst.msk [vmem:[%s2520_s2 + $0x50] sm:$0xff] %vm29_vm0, %v1143_v31  ;;  %v985_v9 = vmul.f32 0.9, %v897_v14  ;;  %v1017_v18 = vmul.f32 0.0001002004, %v897_v14 }
 0x182   :  { %v384_v6 = vsub.f32 -0.9226792, %v367_v27  ;;  %v1100_v42 = vsel %vm972_vm12, %v1084_v54, 0.0 }
 0x183   :  { %v1001_v33 = vsub.f32 -0.09482446, %v985_v9  ;;  %v1033_v48 = vsub.f32 -0.0009226792, %v1017_v18 }
 0x184   :  { %v466_v53 = vsub.f32 %v384_v6, %v433_v47 }
 0x185   :  { %v1065_v45 = vsel %vm1049_vm3, 0.0, %v1033_v48  ;;  %v915_v29 = vpop.xlane.xlu0 %914 }
 0x186   :  { %v1081_v40 = vsub.f32 %v1001_v33, %v1065_v45  ;;  %v987_v12 = vmul.f32 0.9, %v915_v29  ;;  %v1019_v57 = vmul.f32 0.0001002004, %v915_v29 }
 0x188   :  { %v1097_v46 = vsel %vm2486_vm5, %v1081_v40, 0.0  ;;  %v1003_v59 = vsub.f32 -0.09482446, %v987_v12  ;;  %v1035_v7 = vsub.f32 -0.0009226792, %v1019_v57 }
 0x189   :  { %v1113_v24 = vadd.f32 %v1097_v46, %v464_v20  ;;  %v351_v4 = vpop.xlane.xlu0 %350 }
 0x18a   :  { %v1067_v36 = vsel %vm1051_vm6, 0.0, %v1035_v7  ;;  %v368_v43 = vmul.f32 0.0001002004, %v351_v4 }
 0x18b   :  { %v1145_v8 = vadd.f32 %v1129_v55, %v1113_v24  ;;  %v1083_v21 = vsub.f32 %v1003_v59, %v1067_v36 }
 0x18c   :  { %v385_v25 = vsub.f32 -0.9226792, %v368_v43 }
 0x18d   :  { %1162 = vst.msk [vmem:[%s2520_s2 + $0x60] sm:$0xff] %vm29_vm0, %v1145_v8  ;;  %v1099_v61 = vsel %vm971_vm11, %v1083_v21, 0.0 }
 0x18e   :  { %v1115_v13 = vadd.f32 %v1099_v61, %v466_v53  ;;  %v467_v16 = vsub.f32 %v385_v25, %v434_v0 }
 0x190   :  { %v1147_v52 = vadd.f32 %v1131_v62, %v1115_v13  ;;  %v1116_v15 = vadd.f32 %v1100_v42, %v467_v16 }
 0x192   :  { %1164 = vst.msk [vmem:[%s2520_s2 + $0x70] sm:$0xff] %vm29_vm0, %v1147_v52  ;;  %v1148_v58 = vadd.f32 %v1132_v22, %v1116_v15 }
 0x194   :  { %1165 = vst.msk [vmem:[%s2520_s2 + $0x78] sm:$0xff] %vm29_vm0, %v1148_v58 }
 0x195   :  { %1170 = vsyncpa [#allocation3], 1 }

</bundles_post_ra>
